<compile_context>
chip_gen: v5e
topology: v5e:2x2
jax: 0.10.0
libtpu: 0.0.40
codegen_flags: <defaults>
</compile_context>

<pallas_src>
import jax
import jax.numpy as jnp
from jax import lax
from jax.experimental import pallas as pl
from jax.experimental.pallas import tpu as pltpu


# ----------------------------- Fused CBAM kernel -----------------------------
def cbam_kernel(x_ref, w1_ref, b1_ref, w2_ref, b2_ref, m_ref, bn_ref, out_ref):
    # x_ref: (BB, C, HW) lane-dense block of BB images.
    BB, C, HW = x_ref.shape
    x = x_ref[...]                                            # (BB, C, HW) f32

    # ---------------- Channel gate ----------------
    avg = jnp.sum(x, axis=2) * (1.0 / HW)                     # (BB, C)  avg_pool2d
    mx = jnp.max(x, axis=2)                                   # (BB, C)  max_pool2d
    pooled = jnp.concatenate([avg, mx], axis=0)               # (2*BB, C): [avg ; max]

    # Shared MLP applied to both pooled vectors of every image: 2 matmuls total.
    h = jnp.maximum(
        jnp.dot(pooled, w1_ref[...], preferred_element_type=jnp.float32)
        + b1_ref[...], 0.0)                                   # (2*BB, HP)
    a = (jnp.dot(h, w2_ref[...], preferred_element_type=jnp.float32)
         + b2_ref[...])                                       # (2*BB, C)
    att = a[:BB] + a[BB:]                                     # mlp(avg)+mlp(max), (BB, C)

    xg = x * jax.nn.sigmoid(att)[:, :, None]                  # (BB, C, HW), stays in VMEM

    # ---------------- Spatial gate ----------------
    cmax = jnp.max(xg, axis=1)                                # (BB, HW) channel max
    cmean = jnp.sum(xg, axis=1) * (1.0 / C)                   # (BB, HW) channel mean
    pooled_s = jnp.concatenate([cmax, cmean], axis=1).astype(m_ref.dtype)  # (BB, 2*HW)

    # 7x7 "same" conv (+ folded BatchNorm scale) as ONE MXU matmul;
    # bn_ref[0] is the folded BatchNorm shift.
    y = (jnp.dot(pooled_s, m_ref[...], preferred_element_type=jnp.float32)
         + bn_ref[0])                                         # (BB, HW)
    s = jax.nn.sigmoid(y)                                     # (BB, HW) spatial attn

    out_ref[...] = (xg * s[:, None, :]).astype(out_ref.dtype)  # dense lane stores


# ----------------------- Host-side conv -> matmul operator -----------------------
def build_spatial_conv_matrix(wconv, H, W):
    """Turn the 2-in/1-out KxK 'same' conv into a single matmul operator.

    Returns M of shape (2*HW, HW) with
      y_flat = concat([max_flat, mean_flat], -1) @ M
    equal to conv2d(concat([max, mean]), wconv, padding=K//2) flattened.
    Each M entry is exactly one conv weight (or 0), so this is pure, exact
    weight preprocessing.
    """
    K = wconv.shape[-1]
    P = (K - 1) // 2
    HW = H * W
    p = jnp.arange(HW)
    ph = (p // W)[:, None, None]                              # output row (HW,1,1)
    pw = (p % W)[:, None, None]                               # output col (HW,1,1)
    kh = jnp.arange(K)[None, :, None]                         # (1,K,1)
    kw = jnp.arange(K)[None, None, :]                         # (1,1,K)
    sh = ph + kh - P                                          # (HW,K,1) source row
    sw = pw + kw - P                                          # (HW,1,K) source col
    valid = (sh >= 0) & (sh < H) & (sw >= 0) & (sw < W)       # (HW,K,K)
    src = sh * W + sw                                         # (HW,K,K) source flat idx
    onehot = ((src[..., None] == jnp.arange(HW)) & valid[..., None]).astype(jnp.float32)
    # onehot[p, kh, kw, q] = 1 iff input pixel q feeds output pixel p via tap (kh,kw)
    m = jnp.einsum('ckl,pklq->cqp', wconv[0].astype(jnp.float32), onehot)  # (2, HW, HW)
    return m.reshape(2 * HW, HW)   # rows [0:HW] = max-channel taps, [HW:] = mean-channel


# ----------------------------- Wrapper -----------------------------
def _pick_block_batch(B, C, HW, bytes_per_elem=4, vmem_budget=8 << 20):
    """Images per grid step: big enough to amortize per-step overhead / fatten
    DMAs, small enough that double-buffered (in + out) blocks stay well inside
    scoped VMEM (v5e default 16 MiB), and leaving >= 2 grid steps so both v7x
    TensorCores get work."""
    per_img = C * HW * bytes_per_elem
    cap = max(1, min(64, vmem_budget // (4 * per_img)))       # 2 bufs x (in + out)
    if B >= 2:
        cap = min(cap, B // 2)                                # keep >= 2 grid steps
    bb = 1
    for d in range(1, B + 1):
        if B % d == 0 and d <= cap:
            bb = d
    return bb


def cbam_forward(x, w1, b1, w2, b2, wconv, bn_gamma, bn_beta, bn_mean, bn_var,
                 eps=1e-5, conv_dtype=jnp.bfloat16):
    B, C, H, W = x.shape
    HW = H * W
    hidden = w1.shape[0]

    # Pad the MLP hidden dim to a multiple of 8 (zero rows/cols keep the math
    # exact: relu(0 + 0) = 0 and the matching w2 rows are zero).
    HP = max(8, ((hidden + 7) // 8) * 8)
    w1t = jnp.zeros((C, HP), jnp.float32).at[:, :hidden].set(w1.T)   # for pooled @ w1.T
    b1r = jnp.zeros((1, HP), jnp.float32).at[0, :hidden].set(b1)
    w2t = jnp.zeros((HP, C), jnp.float32).at[:hidden].set(w2.T)      # for h @ w2.T
    b2r = b2.reshape(1, C).astype(jnp.float32)

    # Fold eval-mode BatchNorm: scale into the conv operator, shift is a scalar.
    bn_scale = bn_gamma / jnp.sqrt(bn_var + eps)
    bn_shift = bn_beta - bn_mean * bn_scale
    conv_mat = (build_spatial_conv_matrix(wconv, H, W) * bn_scale).astype(conv_dtype)
    bn_shift_arr = jnp.reshape(bn_shift, (1,)).astype(jnp.float32)

    BB = _pick_block_batch(B, C, HW, bytes_per_elem=x.dtype.itemsize)
    x_flat = x.reshape(B, C, HW)

    def build_call(single_buffer):
        def const_spec(shape):
            rank = len(shape)
            idx = lambda b: (0,) * rank
            if single_buffer:
                # Grid-invariant operand: single-buffer it (pure VMEM headroom).
                return pl.BlockSpec(shape, idx,
                                    pipeline_mode=pl.Buffered(buffer_count=1))
            return pl.BlockSpec(shape, idx)

        return pl.pallas_call(
            cbam_kernel,
            out_shape=jax.ShapeDtypeStruct((B, C, HW), x.dtype),
            grid_spec=pltpu.PrefetchScalarGridSpec(
                num_scalar_prefetch=0,
                grid=(B // BB,),
                in_specs=[
                    pl.BlockSpec((BB, C, HW), lambda b: (b, 0, 0)),      # x (per block)
                    const_spec((C, HP)),                                 # w1^T (resident)
                    const_spec((1, HP)),                                 # b1
                    const_spec((HP, C)),                                 # w2^T
                    const_spec((1, C)),                                  # b2
                    const_spec((2 * HW, HW)),                            # fused conv op
                    pl.BlockSpec(memory_space=pltpu.MemorySpace.SMEM),   # bn shift scalar
                ],
                out_specs=pl.BlockSpec((BB, C, HW), lambda b: (b, 0, 0)),
            ),
            compiler_params=pltpu.CompilerParams(
                dimension_semantics=("parallel",)),
        )

    args = (x_flat, w1t, b1r, w2t, b2r, conv_mat, bn_shift_arr)
    try:
        out_flat = build_call(single_buffer=True)(*args)
    except Exception:
        # Compatibility guard: fall back to default double-buffered specs if
        # this jax/Mosaic build does not accept pipeline_mode=pl.Buffered here.
        out_flat = build_call(single_buffer=False)(*args)
    return out_flat.reshape(B, C, H, W)


# ----------------------------- Pure-JAX reference -----------------------------
def cbam_ref(x, w1, b1, w2, b2, wconv, bn_gamma, bn_beta, bn_mean, bn_var, eps=1e-5):
    avg = x.mean(axis=(2, 3))
    mx = x.max(axis=(2, 3))

    def mlp(v):
        h = jnp.maximum(v @ w1.T + b1, 0.0)
        return h @ w2.T + b2

    att = mlp(avg) + mlp(mx)
    xg = x * jax.nn.sigmoid(att)[:, :, None, None]

    cp = jnp.concatenate(
        [xg.max(axis=1, keepdims=True), xg.mean(axis=1, keepdims=True)], axis=1)
    y = lax.conv_general_dilated(cp, wconv, window_strides=(1, 1),
                                 padding=((3, 3), (3, 3)),
                                 dimension_numbers=("NCHW", "OIHW", "NCHW"))
    y = (y - bn_mean) * (bn_gamma / jnp.sqrt(bn_var + eps)) + bn_beta
    return xg * jax.nn.sigmoid(y)


if __name__ == "__main__":
    B, C, H, W = 4, 32, 16, 16
    reduction_ratio = 16
    hidden = C // reduction_ratio  # 2

    key = jax.random.PRNGKey(0)
    kx, k1, k2, k3, k4, k5 = jax.random.split(key, 6)
    x = jax.random.normal(kx, (B, C, H, W), jnp.float32)

    # ChannelGate MLP params (nn.Linear weights are (out, in))
    w1 = jax.random.normal(k1, (hidden, C), jnp.float32) * 0.2
    b1 = jax.random.normal(k2, (hidden,), jnp.float32) * 0.1
    w2 = jax.random.normal(k3, (C, hidden), jnp.float32) * 0.2
    b2 = jax.random.normal(k4, (C,), jnp.float32) * 0.1

    # SpatialGate conv (out=1, in=2, 7x7, no bias) + BatchNorm2d(1) params
    wconv = jax.random.normal(k5, (1, 2, 7, 7), jnp.float32) * 0.1
    bn_gamma = jnp.float32(1.25)
    bn_beta = jnp.float32(-0.1)
    bn_mean = jnp.float32(0.05)
    bn_var = jnp.float32(0.8)

    out = cbam_forward(x, w1, b1, w2, b2, wconv, bn_gamma, bn_beta, bn_mean, bn_var)
    out = jax.block_until_ready(out)

    ref = cbam_ref(x, w1, b1, w2, b2, wconv, bn_gamma, bn_beta, bn_mean, bn_var)
    assert out.shape == (B, C, H, W)
    # Tolerance relaxed vs. v1 because the spatial-conv operator is stored in
    # bfloat16 (per perf review); the channel gate stays f32.
    assert jnp.allclose(out, ref, atol=5e-2, rtol=5e-2), (
        float(jnp.max(jnp.abs(out - ref))))
    print("KERNEL_OK")
</pallas_src>

<mosaic_0001>
module attributes {stable_mosaic.version = 11 : i64} {
  func.func @cbam_kernel(%arg0: i32, %arg1: memref<2x32x256xf32, #tpu.memory_space<vmem>>, %arg2: memref<32x8xf32, #tpu.memory_space<vmem>>, %arg3: memref<1x8xf32, #tpu.memory_space<vmem>>, %arg4: memref<8x32xf32, #tpu.memory_space<vmem>>, %arg5: memref<1x32xf32, #tpu.memory_space<vmem>>, %arg6: memref<512x256xbf16, #tpu.memory_space<vmem>>, %arg7: memref<1xf32, #tpu.memory_space<smem>>, %arg8: memref<2x32x256xf32, #tpu.memory_space<vmem>>) attributes {dimension_semantics = [#tpu.dimension_semantics<parallel>], iteration_bounds = array<i64: 2>, scalar_prefetch = 0 : i64, scratch_operands = 0 : i64, tpu.core_type = #tpu.core_type<tc>, window_params = [{transform_indices = @transform_0, window_bounds = array<i64: 2, 32, 256>}, {pipeline_mode = #tpu.pipeline_mode<synchronous>, transform_indices = @transform_1, window_bounds = array<i64: 32, 8>}, {pipeline_mode = #tpu.pipeline_mode<synchronous>, transform_indices = @transform_2, window_bounds = array<i64: 1, 8>}, {pipeline_mode = #tpu.pipeline_mode<synchronous>, transform_indices = @transform_3, window_bounds = array<i64: 8, 32>}, {pipeline_mode = #tpu.pipeline_mode<synchronous>, transform_indices = @transform_4, window_bounds = array<i64: 1, 32>}, {pipeline_mode = #tpu.pipeline_mode<synchronous>, transform_indices = @transform_5, window_bounds = array<i64: 512, 256>}, {transform_indices = @transform_6, window_bounds = array<i64: 1>}, {transform_indices = @transform_7, window_bounds = array<i64: 2, 32, 256>}]} {
    %c0 = arith.constant 0 : index
    %c0_0 = arith.constant 0 : index
    %c0_1 = arith.constant 0 : index
    %0 = vector.load %arg1[%c0, %c0_0, %c0_1] : memref<2x32x256xf32, #tpu.memory_space<vmem>>, vector<2x32x256xf32>
    %cst = arith.constant dense<0.000000e+00> : vector<2x32xf32>
    %1 = vector.multi_reduction <add>, %0, %cst [2] : vector<2x32x256xf32> to vector<2x32xf32>
    %cst_2 = arith.constant 3.906250e-03 : f32
    %2 = vector.broadcast %cst_2 : f32 to vector<2x32xf32>
    %3 = arith.mulf %1, %2 : vector<2x32xf32>
    %cst_3 = arith.constant dense<0xFF800000> : vector<2x32xf32>
    %4 = vector.multi_reduction <maximumf>, %0, %cst_3 [2] : vector<2x32x256xf32> to vector<2x32xf32>
    %5 = tpu.concatenate %3, %4 in 0 : vector<2x32xf32>, vector<2x32xf32> -> vector<4x32xf32>
    %c0_4 = arith.constant 0 : index
    %c0_5 = arith.constant 0 : index
    %6 = vector.load %arg2[%c0_4, %c0_5] : memref<32x8xf32, #tpu.memory_space<vmem>>, vector<32x8xf32>
    %cst_6 = arith.constant dense<0.000000e+00> : vector<4x8xf32>
    %7 = tpu.matmul %5, %6, %cst_6 {dimension_numbers = #tpu.dot_dimension_numbers<[1], [0], [0], [1], [0, 0, 1, 1], [], []>} : vector<4x32xf32>, vector<32x8xf32>, vector<4x8xf32> -> vector<4x8xf32>
    %c0_7 = arith.constant 0 : index
    %c0_8 = arith.constant 0 : index
    %8 = vector.load %arg3[%c0_7, %c0_8] : memref<1x8xf32, #tpu.memory_space<vmem>>, vector<1x8xf32>
    %9 = vector.broadcast %8 : vector<1x8xf32> to vector<4x8xf32>
    %10 = arith.addf %7, %9 : vector<4x8xf32>
    %cst_9 = arith.constant 0.000000e+00 : f32
    %11 = vector.broadcast %cst_9 : f32 to vector<4x8xf32>
    %12 = arith.maximumf %10, %11 : vector<4x8xf32>
    %c0_10 = arith.constant 0 : index
    %c0_11 = arith.constant 0 : index
    %13 = vector.load %arg4[%c0_10, %c0_11] : memref<8x32xf32, #tpu.memory_space<vmem>>, vector<8x32xf32>
    %cst_12 = arith.constant dense<0.000000e+00> : vector<4x32xf32>
    %14 = tpu.matmul %12, %13, %cst_12 {dimension_numbers = #tpu.dot_dimension_numbers<[1], [0], [0], [1], [0, 0, 1, 1], [], []>} : vector<4x8xf32>, vector<8x32xf32>, vector<4x32xf32> -> vector<4x32xf32>
    %c0_13 = arith.constant 0 : index
    %c0_14 = arith.constant 0 : index
    %15 = vector.load %arg5[%c0_13, %c0_14] : memref<1x32xf32, #tpu.memory_space<vmem>>, vector<1x32xf32>
    %16 = vector.broadcast %15 : vector<1x32xf32> to vector<4x32xf32>
    %17 = arith.addf %14, %16 : vector<4x32xf32>
    %18 = vector.extract_strided_slice %17 {offsets = [0, 0], sizes = [2, 32], strides = [1, 1]} : vector<4x32xf32> to vector<2x32xf32>
    %19 = vector.extract_strided_slice %17 {offsets = [2, 0], sizes = [2, 32], strides = [1, 1]} : vector<4x32xf32> to vector<2x32xf32>
    %20 = arith.addf %18, %19 : vector<2x32xf32>
    %21 = arith.negf %20 : vector<2x32xf32>
    %22 = math.exp %21 : vector<2x32xf32>
    %cst_15 = arith.constant 1.000000e+00 : f32
    %23 = vector.broadcast %cst_15 : f32 to vector<2x32xf32>
    %24 = arith.addf %23, %22 : vector<2x32xf32>
    %25 = arith.divf %23, %24 : vector<2x32xf32>
    %26 = vector.shape_cast %25 : vector<2x32xf32> to vector<2x32x1xf32>
    %27 = vector.broadcast %26 : vector<2x32x1xf32> to vector<2x32x256xf32>
    %28 = arith.mulf %0, %27 : vector<2x32x256xf32>
    %cst_16 = arith.constant dense<0xFF800000> : vector<2x256xf32>
    %29 = vector.multi_reduction <maximumf>, %28, %cst_16 [1] : vector<2x32x256xf32> to vector<2x256xf32>
    %cst_17 = arith.constant dense<0.000000e+00> : vector<2x256xf32>
    %30 = vector.multi_reduction <add>, %28, %cst_17 [1] : vector<2x32x256xf32> to vector<2x256xf32>
    %cst_18 = arith.constant 3.125000e-02 : f32
    %31 = vector.broadcast %cst_18 : f32 to vector<2x256xf32>
    %32 = arith.mulf %30, %31 : vector<2x256xf32>
    %33 = tpu.concatenate %29, %32 in 1 : vector<2x256xf32>, vector<2x256xf32> -> vector<2x512xf32>
    %34 = arith.truncf %33 : vector<2x512xf32> to vector<2x512xbf16>
    %c0_19 = arith.constant 0 : index
    %c0_20 = arith.constant 0 : index
    %35 = vector.load %arg6[%c0_19, %c0_20] : memref<512x256xbf16, #tpu.memory_space<vmem>>, vector<512x256xbf16>
    %cst_21 = arith.constant dense<0.000000e+00> : vector<2x256xf32>
    %36 = tpu.matmul %34, %35, %cst_21 {dimension_numbers = #tpu.dot_dimension_numbers<[1], [0], [0], [1], [0, 0, 1, 1], [], []>} : vector<2x512xbf16>, vector<512x256xbf16>, vector<2x256xf32> -> vector<2x256xf32>
    %c0_22 = arith.constant 0 : index
    %37 = memref.load %arg7[%c0_22] : memref<1xf32, #tpu.memory_space<smem>>
    %38 = vector.broadcast %37 : f32 to vector<2x256xf32>
    %39 = arith.addf %36, %38 : vector<2x256xf32>
    %40 = arith.negf %39 : vector<2x256xf32>
    %41 = math.exp %40 : vector<2x256xf32>
    %cst_23 = arith.constant 1.000000e+00 : f32
    %42 = vector.broadcast %cst_23 : f32 to vector<2x256xf32>
    %43 = arith.addf %42, %41 : vector<2x256xf32>
    %44 = arith.divf %42, %43 : vector<2x256xf32>
    %45 = vector.shape_cast %44 : vector<2x256xf32> to vector<2x1x256xf32>
    %46 = vector.broadcast %45 : vector<2x1x256xf32> to vector<2x32x256xf32>
    %47 = arith.mulf %28, %46 : vector<2x32x256xf32>
    %c0_24 = arith.constant 0 : index
    %c0_25 = arith.constant 0 : index
    %c0_26 = arith.constant 0 : index
    %48 = vector.load %arg8[%c0_24, %c0_25, %c0_26] : memref<2x32x256xf32, #tpu.memory_space<vmem>>, vector<2x32x256xf32>
    tpu.vector_store %arg8[%c0_24, %c0_25, %c0_26], %47 {strides = array<i32>} : memref<2x32x256xf32, #tpu.memory_space<vmem>>, vector<2x32x256xf32>,
    return
  }
  func.func @transform_0(%arg0: i32) -> (i32, i32, i32) {
    %c0_i32 = arith.constant 0 : i32
    %c0_i32_0 = arith.constant 0 : i32
    %c0_i32_1 = arith.constant 0 : i32
    return %arg0, %c0_i32, %c0_i32_0 : i32, i32, i32
  }
  func.func @transform_1(%arg0: i32) -> (i32, i32) {
    %c0_i32 = arith.constant 0 : i32
    %c0_i32_0 = arith.constant 0 : i32
    %c0_i32_1 = arith.constant 0 : i32
    return %c0_i32, %c0_i32_0 : i32, i32
  }
  func.func @transform_2(%arg0: i32) -> (i32, i32) {
    %c0_i32 = arith.constant 0 : i32
    %c0_i32_0 = arith.constant 0 : i32
    %c0_i32_1 = arith.constant 0 : i32
    return %c0_i32, %c0_i32_0 : i32, i32
  }
  func.func @transform_3(%arg0: i32) -> (i32, i32) {
    %c0_i32 = arith.constant 0 : i32
    %c0_i32_0 = arith.constant 0 : i32
    %c0_i32_1 = arith.constant 0 : i32
    return %c0_i32, %c0_i32_0 : i32, i32
  }
  func.func @transform_4(%arg0: i32) -> (i32, i32) {
    %c0_i32 = arith.constant 0 : i32
    %c0_i32_0 = arith.constant 0 : i32
    %c0_i32_1 = arith.constant 0 : i32
    return %c0_i32, %c0_i32_0 : i32, i32
  }
  func.func @transform_5(%arg0: i32) -> (i32, i32) {
    %c0_i32 = arith.constant 0 : i32
    %c0_i32_0 = arith.constant 0 : i32
    %c0_i32_1 = arith.constant 0 : i32
    return %c0_i32, %c0_i32_0 : i32, i32
  }
  func.func @transform_6(%arg0: i32) -> i32 {
    %c0_i32 = arith.constant 0 : i32
    %c0_i32_0 = arith.constant 0 : i32
    return %c0_i32 : i32
  }
  func.func @transform_7(%arg0: i32) -> (i32, i32, i32) {
    %c0_i32 = arith.constant 0 : i32
    %c0_i32_0 = arith.constant 0 : i32
    %c0_i32_1 = arith.constant 0 : i32
    return %arg0, %c0_i32, %c0_i32_0 : i32, i32, i32
  }
}

module attributes {stable_mosaic.version = 11 : i64} {
  func.func @cbam_kernel(%arg0: i32, %arg1: memref<2x32x256xf32, #tpu.memory_space<vmem>>, %arg2: memref<32x8xf32, #tpu.memory_space<vmem>>, %arg3: memref<1x8xf32, #tpu.memory_space<vmem>>, %arg4: memref<8x32xf32, #tpu.memory_space<vmem>>, %arg5: memref<1x32xf32, #tpu.memory_space<vmem>>, %arg6: memref<512x256xbf16, #tpu.memory_space<vmem>>, %arg7: memref<1xf32, #tpu.memory_space<smem>>, %arg8: memref<2x32x256xf32, #tpu.memory_space<vmem>>) attributes {dimension_semantics = [#tpu.dimension_semantics<parallel>], iteration_bounds = array<i64: 2>, scalar_prefetch = 0 : i64, scratch_operands = 0 : i64, tpu.core_type = #tpu.core_type<tc>, window_params = [{transform_indices = @transform_0, window_bounds = array<i64: 2, 32, 256>}, {pipeline_mode = #tpu.pipeline_mode<synchronous>, transform_indices = @transform_1, window_bounds = array<i64: 32, 8>}, {pipeline_mode = #tpu.pipeline_mode<synchronous>, transform_indices = @transform_2, window_bounds = array<i64: 1, 8>}, {pipeline_mode = #tpu.pipeline_mode<synchronous>, transform_indices = @transform_3, window_bounds = array<i64: 8, 32>}, {pipeline_mode = #tpu.pipeline_mode<synchronous>, transform_indices = @transform_4, window_bounds = array<i64: 1, 32>}, {pipeline_mode = #tpu.pipeline_mode<synchronous>, transform_indices = @transform_5, window_bounds = array<i64: 512, 256>}, {transform_indices = @transform_6, window_bounds = array<i64: 1>}, {transform_indices = @transform_7, window_bounds = array<i64: 2, 32, 256>}]} {
    %c0 = arith.constant 0 : index
    %c0_0 = arith.constant 0 : index
    %c0_1 = arith.constant 0 : index
    %0 = vector.load %arg1[%c0, %c0_0, %c0_1] : memref<2x32x256xf32, #tpu.memory_space<vmem>>, vector<2x32x256xf32>
    %cst = arith.constant dense<0.000000e+00> : vector<2x32xf32>
    %1 = vector.multi_reduction <add>, %0, %cst [2] : vector<2x32x256xf32> to vector<2x32xf32>
    %cst_2 = arith.constant 3.906250e-03 : f32
    %2 = vector.broadcast %cst_2 : f32 to vector<2x32xf32>
    %3 = arith.mulf %1, %2 : vector<2x32xf32>
    %cst_3 = arith.constant dense<0xFF800000> : vector<2x32xf32>
    %4 = vector.multi_reduction <maximumf>, %0, %cst_3 [2] : vector<2x32x256xf32> to vector<2x32xf32>
    %5 = tpu.concatenate %3, %4 in 0 : vector<2x32xf32>, vector<2x32xf32> -> vector<4x32xf32>
    %c0_4 = arith.constant 0 : index
    %c0_5 = arith.constant 0 : index
    %6 = vector.load %arg2[%c0_4, %c0_5] : memref<32x8xf32, #tpu.memory_space<vmem>>, vector<32x8xf32>
    %cst_6 = arith.constant dense<0.000000e+00> : vector<4x8xf32>
    %7 = tpu.matmul %5, %6, %cst_6 {dimension_numbers = #tpu.dot_dimension_numbers<[1], [0], [0], [1], [0, 0, 1, 1], [], []>} : vector<4x32xf32>, vector<32x8xf32>, vector<4x8xf32> -> vector<4x8xf32>
    %c0_7 = arith.constant 0 : index
    %c0_8 = arith.constant 0 : index
    %8 = vector.load %arg3[%c0_7, %c0_8] : memref<1x8xf32, #tpu.memory_space<vmem>>, vector<1x8xf32>
    %9 = vector.broadcast %8 : vector<1x8xf32> to vector<4x8xf32>
    %10 = arith.addf %7, %9 : vector<4x8xf32>
    %cst_9 = arith.constant 0.000000e+00 : f32
    %11 = vector.broadcast %cst_9 : f32 to vector<4x8xf32>
    %12 = arith.maximumf %10, %11 : vector<4x8xf32>
    %c0_10 = arith.constant 0 : index
    %c0_11 = arith.constant 0 : index
    %13 = vector.load %arg4[%c0_10, %c0_11] : memref<8x32xf32, #tpu.memory_space<vmem>>, vector<8x32xf32>
    %cst_12 = arith.constant dense<0.000000e+00> : vector<4x32xf32>
    %14 = tpu.matmul %12, %13, %cst_12 {dimension_numbers = #tpu.dot_dimension_numbers<[1], [0], [0], [1], [0, 0, 1, 1], [], []>} : vector<4x8xf32>, vector<8x32xf32>, vector<4x32xf32> -> vector<4x32xf32>
    %c0_13 = arith.constant 0 : index
    %c0_14 = arith.constant 0 : index
    %15 = vector.load %arg5[%c0_13, %c0_14] : memref<1x32xf32, #tpu.memory_space<vmem>>, vector<1x32xf32>
    %16 = vector.broadcast %15 : vector<1x32xf32> to vector<4x32xf32>
    %17 = arith.addf %14, %16 : vector<4x32xf32>
    %18 = vector.extract_strided_slice %17 {offsets = [0, 0], sizes = [2, 32], strides = [1, 1]} : vector<4x32xf32> to vector<2x32xf32>
    %19 = vector.extract_strided_slice %17 {offsets = [2, 0], sizes = [2, 32], strides = [1, 1]} : vector<4x32xf32> to vector<2x32xf32>
    %20 = arith.addf %18, %19 : vector<2x32xf32>
    %21 = arith.negf %20 : vector<2x32xf32>
    %22 = math.exp %21 : vector<2x32xf32>
    %cst_15 = arith.constant 1.000000e+00 : f32
    %23 = vector.broadcast %cst_15 : f32 to vector<2x32xf32>
    %24 = arith.addf %23, %22 : vector<2x32xf32>
    %25 = arith.divf %23, %24 : vector<2x32xf32>
    %26 = vector.shape_cast %25 : vector<2x32xf32> to vector<2x32x1xf32>
    %27 = vector.broadcast %26 : vector<2x32x1xf32> to vector<2x32x256xf32>
    %28 = arith.mulf %0, %27 : vector<2x32x256xf32>
    %cst_16 = arith.constant dense<0xFF800000> : vector<2x256xf32>
    %29 = vector.multi_reduction <maximumf>, %28, %cst_16 [1] : vector<2x32x256xf32> to vector<2x256xf32>
    %cst_17 = arith.constant dense<0.000000e+00> : vector<2x256xf32>
    %30 = vector.multi_reduction <add>, %28, %cst_17 [1] : vector<2x32x256xf32> to vector<2x256xf32>
    %cst_18 = arith.constant 3.125000e-02 : f32
    %31 = vector.broadcast %cst_18 : f32 to vector<2x256xf32>
    %32 = arith.mulf %30, %31 : vector<2x256xf32>
    %33 = tpu.concatenate %29, %32 in 1 : vector<2x256xf32>, vector<2x256xf32> -> vector<2x512xf32>
    %34 = arith.truncf %33 : vector<2x512xf32> to vector<2x512xbf16>
    %c0_19 = arith.constant 0 : index
    %c0_20 = arith.constant 0 : index
    %35 = vector.load %arg6[%c0_19, %c0_20] : memref<512x256xbf16, #tpu.memory_space<vmem>>, vector<512x256xbf16>
    %cst_21 = arith.constant dense<0.000000e+00> : vector<2x256xf32>
    %36 = tpu.matmul %34, %35, %cst_21 {dimension_numbers = #tpu.dot_dimension_numbers<[1], [0], [0], [1], [0, 0, 1, 1], [], []>} : vector<2x512xbf16>, vector<512x256xbf16>, vector<2x256xf32> -> vector<2x256xf32>
    %c0_22 = arith.constant 0 : index
    %37 = memref.load %arg7[%c0_22] : memref<1xf32, #tpu.memory_space<smem>>
    %38 = vector.broadcast %37 : f32 to vector<2x256xf32>
    %39 = arith.addf %36, %38 : vector<2x256xf32>
    %40 = arith.negf %39 : vector<2x256xf32>
    %41 = math.exp %40 : vector<2x256xf32>
    %cst_23 = arith.constant 1.000000e+00 : f32
    %42 = vector.broadcast %cst_23 : f32 to vector<2x256xf32>
    %43 = arith.addf %42, %41 : vector<2x256xf32>
    %44 = arith.divf %42, %43 : vector<2x256xf32>
    %45 = vector.shape_cast %44 : vector<2x256xf32> to vector<2x1x256xf32>
    %46 = vector.broadcast %45 : vector<2x1x256xf32> to vector<2x32x256xf32>
    %47 = arith.mulf %28, %46 : vector<2x32x256xf32>
    %c0_24 = arith.constant 0 : index
    %c0_25 = arith.constant 0 : index
    %c0_26 = arith.constant 0 : index
    %48 = vector.load %arg8[%c0_24, %c0_25, %c0_26] : memref<2x32x256xf32, #tpu.memory_space<vmem>>, vector<2x32x256xf32>
    tpu.vector_store %arg8[%c0_24, %c0_25, %c0_26], %47 {strides = array<i32>} : memref<2x32x256xf32, #tpu.memory_space<vmem>>, vector<2x32x256xf32>,
    return
  }
  func.func @transform_0(%arg0: i32) -> (i32, i32, i32) {
    %c0_i32 = arith.constant 0 : i32
    %c0_i32_0 = arith.constant 0 : i32
    %c0_i32_1 = arith.constant 0 : i32
    return %arg0, %c0_i32, %c0_i32_0 : i32, i32, i32
  }
  func.func @transform_1(%arg0: i32) -> (i32, i32) {
    %c0_i32 = arith.constant 0 : i32
    %c0_i32_0 = arith.constant 0 : i32
    %c0_i32_1 = arith.constant 0 : i32
    return %c0_i32, %c0_i32_0 : i32, i32
  }
  func.func @transform_2(%arg0: i32) -> (i32, i32) {
    %c0_i32 = arith.constant 0 : i32
    %c0_i32_0 = arith.constant 0 : i32
    %c0_i32_1 = arith.constant 0 : i32
    return %c0_i32, %c0_i32_0 : i32, i32
  }
  func.func @transform_3(%arg0: i32) -> (i32, i32) {
    %c0_i32 = arith.constant 0 : i32
    %c0_i32_0 = arith.constant 0 : i32
    %c0_i32_1 = arith.constant 0 : i32
    return %c0_i32, %c0_i32_0 : i32, i32
  }
  func.func @transform_4(%arg0: i32) -> (i32, i32) {
    %c0_i32 = arith.constant 0 : i32
    %c0_i32_0 = arith.constant 0 : i32
    %c0_i32_1 = arith.constant 0 : i32
    return %c0_i32, %c0_i32_0 : i32, i32
  }
  func.func @transform_5(%arg0: i32) -> (i32, i32) {
    %c0_i32 = arith.constant 0 : i32
    %c0_i32_0 = arith.constant 0 : i32
    %c0_i32_1 = arith.constant 0 : i32
    return %c0_i32, %c0_i32_0 : i32, i32
  }
  func.func @transform_6(%arg0: i32) -> i32 {
    %c0_i32 = arith.constant 0 : i32
    %c0_i32_0 = arith.constant 0 : i32
    return %c0_i32 : i32
  }
  func.func @transform_7(%arg0: i32) -> (i32, i32, i32) {
    %c0_i32 = arith.constant 0 : i32
    %c0_i32_0 = arith.constant 0 : i32
    %c0_i32_1 = arith.constant 0 : i32
    return %arg0, %c0_i32, %c0_i32_0 : i32, i32, i32
  }
}

</mosaic_0001>

<bundles_post_ra>
// kernel: tpu_custom_call.1
= control target key start
LH: loop header
LB: loop body
LE: loop exit
PB: predicated region body
PF: predicated region fallthrough
CT: control target
= control target key end

     0   :  { %s2378_s0 = inlined_call_operand.hbm [shape: f32[4,32,256], index: 0, kind: input, shape index: {}]   ;;  %s2379_s1 = inlined_call_operand.vmem [shape: f32[32,8], index: 1, kind: input, shape index: {}]   ;;  %s2380_s2 = inlined_call_operand.vmem [shape: f32[1,8], index: 2, kind: input, shape index: {}]   ;;  %s2381_s3 = inlined_call_operand.vmem [shape: f32[8,32], index: 3, kind: input, shape index: {}]   ;;  %s2382_s4 = inlined_call_operand.vmem [shape: f32[1,32], index: 4, kind: input, shape index: {}]   ;;  %s2383_s5 = inlined_call_operand.hbm [shape: bf16[512,256], index: 5, kind: input, shape index: {}]   ;;  %s2384_s6 = inlined_call_operand.<no memory space> [shape: f32[1], index: 6, kind: input, shape index: {}]   ;;  %s2385_s7 = inlined_call_operand.hbm [shape: f32[4,32,256], index: 7, kind: output, shape index: {}]  }
   0x1   :  { %12 = sst [smem:[#allocation2]] %s2384_s6 }
   0x2   :  { %13 = vsyncpa [#allocation4], 0 }
   0x3   :  { %15 = vsyncpa [#allocation4 + $0x1], 0 }
   0x4   :  { %16 = vsyncpa [#allocation7], 0 }
   0x5   :  { %17 = vsyncpa [#allocation5], 0 }
   0x6   :  { %19 = vsyncpa [#allocation5 + $0x1], 0  ;;  %s1988_s26 = smov 0   ;;  %s1990_s27 = smov 0  }
   0x7   :  { %s1992_s28 = smov 0   ;;  %s1994_s29 = smov 0  }
   0x8 LB: > { %s2009_s6 = sadd.s32 4294967295, %s1936_s29   ;;  %s1374_s30 = sadd.s32 4294967294, %s1936_s29   ;;  %s1936_s29 = sphi %s1994_s29, %s2395_s29   ;;  %s1932_s28 = sphi %s1992_s28, %s2394_s28   ;;  %s1928_s27 = sphi %s1990_s27, %s2393_s27   ;;  %s1924_s26 = sphi %s1988_s26, %s2392_s26  }
   0x9   : > { %p45_p0 = scmp.ne.s32.totalorder %s1928_s27, %s1924_s26  ;;  %p46_p1 = scmp.eq.s32.totalorder %s2009_s6, 0 }
   0xa   : > { %p195_p2 = scmp.eq.s32.totalorder %s2009_s6, 1  ;;  %p201_p3 = scmp.eq.s32.totalorder %s1374_s30, 1 }
   0xb   : > { %p2018_p4 = por %p46_p1, %p45_p0  ;;  %p1375_p5 = scmp.ge.s32.totalorder %s1936_s29, 1 }
   0xc   : > { %p2023_p6 = por %p201_p3, %p45_p0  ;;  %p208_p7 = scmp.lt.s32.totalorder %s1936_s29, 3 }
   0xd   : > { %s231_s12 = sshll.u32 %s2383_s5, 4  ;;  %s1938_s14 = smov [#allocation6]   ;;  %s232_s12 = int_to_ptr.hbm [resolvable:$true] %s231_s12 }
   0xe   : > { %p2031_p8 = pnand %p1375_p5, %p208_p7  ;;  %s233_s15 = sshll.u32 %s1938_s14, 4  ;;  %s234_s15 = int_to_ptr.vmem [resolvable:$true] %s233_s15 }
   0xf   : > { %s2041_s16 = sadd.s32 1, %s1936_s29   ;;  %s1939_s17 = smov 128  }
  0x10   : > { %p1729_p9 = pneg %p2031_p8  ;;  %s1940_s18 = smov 8  }
  0x11   : > { %s29_s19 = ssub.s32 %s1936_s29, %s2041_s16  ;;  %s32_s20 = sadd.s32 1, %s1932_s28 }
  0x12   : > { %p1730_p10 = pnand %p1729_p9, %p46_p1  ;;  %p30_p12 = scmp.eq.s32.totalorder %s29_s19, 0 }
  0x13   : > { %p39_p13 = scmp.ne.s32.totalorder %s1932_s28, %s1928_s27  ;;  %p40_p0 = scmp.eq.s32.totalorder %s1936_s29, 0 }
  0x14   : > { %1732 = dma.hbm_to_vmem [thread:$0]  (!%p1730_p10), %s232_s12, 8192, %s234_s15, [#allocation7], %s1939_s17, %s1939_s17, %s1940_s18  }
  0x15   : > { %p1742_p3 = scmp.lt.s32.totalorder %s1936_s29, 2  ;;  %p41_p5 = por %p40_p0, %p39_p13 }
  0x16   : > { %s2051_s21 = scalar_select %p30_p12, %s1932_s28, %s32_s20  }
  0x17   : > { %p2055_p7 = por %p195_p2, %p39_p13  ;;  %s250_s23 = sand.u32 1, %s1932_s28  }
  0x18   : > { %s1654_s24 = sshll.u32 %s1936_s29, 7  ;;  %s1378_s25 = sshll.u32 %s250_s23, 7 }
  0x19   : > { %s260_s11 = scalar_lea.hbm %s2378_s0, %s1654_s24  ;;  %s254_s14 = scalar_lea.vmem [#allocation3], %s1378_s25 }
  0x1a   : > { %s261_s12 = sshll.u32 %s260_s11, 4  ;;  %s263_s15 = sshll.u32 %s254_s14, 4  ;;  %s262_s12 = int_to_ptr.hbm [resolvable:$true] %s261_s12  ;;  %s264_s15 = int_to_ptr.vmem [resolvable:$true] %s263_s15 }
  0x1b   : > { %p2066_p9 = pnand %p1742_p3, %p41_p5  ;;  %s251_s18 = scalar_lea.sflag [#allocation4], %s250_s23 }
  0x1c   : > { %s1836_s19 = sshra.s32 %s262_s12, 4  ;;  %s1843_s30 = scalar_lea.hbm %s2378_s0, 256  ;;  %s1837_s19 = int_to_ptr.hbm [resolvable:$true] %s1836_s19 }
  0x1d   : > { %s1838_s20 = scalar_lea.hbm %s1837_s19, 128  ;;  %p1840_p10 = pneg %p2066_p9 }
  0x1e   : > { %p1839_p2 = scmp.ne.s32.totalorder %s1837_s19, %s1838_s20  ;;  %p1844_p0 = scmp.lt.s32.totalorder %s1837_s19, %s2378_s0 }
  0x1f   : > { %p1845_p3 = scmp.lt.s32.totalorder %s1843_s30, %s1838_s20 }
  0x20   : > { %p1841_p12 = pnand %p1840_p10, %p1839_p2 }
  0x21   : > { %p1846_p5 = por %p1845_p3, %p1844_p0 }
  0x22   : > { %p1842_p13 = pneg %p1841_p12 }
  0x24   : > { %p1847_p11 = pnand %p1846_p5, %p1842_p13 }
  0x26   : > { %1850 = shalt.err (!%p1847_p11)
}
  0x27   : > { %s1941_s23 = smov 256   ;;  %s1942_s14 = smov 16  }
  0x28   : > { %1736 = dma.hbm_to_vmem [thread:$0]  (!%p2066_p9), %s262_s12, 2048, %s264_s15, %s251_s18, %s1941_s23, %s1941_s23, %s1942_s14  }
  0x29   : > { %275 = sbr.rel (%p2031_p8) target bundleno = 883 (0x373), region = 48  ;;  %s2083_s24 = sand.u32 (!%p2031_p8), 1, %s1928_s27  }
  0x2a   : > { %s1383_s19 = sshll.u32 (!%p2031_p8), %s2083_s24, 7  ;;  %s278_s20 = scalar_lea.sflag (!%p2031_p8), [#allocation4], %s2083_s24 }
  0x2b   : > { %s2089_s25 = scalar_lea.vmem (!%p2031_p8), [#allocation3], %s1383_s19 }
  0x2e   : > { %1911 = dma.done.wait (%p2018_p4), %s278_s20, 2048  }
  0x2f   : > { %1913 = vsyncadd (%p2018_p4), %s278_s20, 4294965248 }
  0x30   : > { %1915 = dma.done.wait (%p46_p1), [#allocation7], 8192  }
  0x31   : > { %1917 = vsyncadd (%p46_p1), [#allocation7], 4294959104  ;;  %v2100_v0 = vld [vmem:[%s2089_s25 + $0x40] sm:$0xff]  ;;  %v2103_v1 = vld [vmem:[%s2089_s25 + $0x48] sm:$0xff]  ;;  %v400_v45 = vlaneseq  ;;  %vm405_vm0 = vcmask 130112   ;;  %vm409_vm1 = vcmask 195712  }
  0x32   : > { %v2106_v2 = vld [vmem:[%s2089_s25] sm:$0xff]  ;;  %v348_v3 = vadd.f32 %v2103_v1, %v2100_v0  ;;  %v2111_v4 = vld [vmem:[%s2089_s25 + $0x8] sm:$0xff]  ;;  %v2124_v9 = vld [vmem:[%s2089_s25 + $0x50] sm:$0xff]  ;;  %v380_v25 = vmax.f32 %v2100_v0, %v2103_v1  ;;  %vm413_vm2 = vcmask 261312   ;;  %vm422_vm3 = vcmask 1041409   ;;  %s763_s13 = sld [smem:[#allocation2]] }
  0x33   : > { %v2114_v5 = vld [vmem:[%s2089_s25 + $0x20] sm:$0xff]  ;;  %v2117_v6 = vld [vmem:[%s2089_s25 + $0x28] sm:$0xff]  ;;  %v336_v7 = vadd.f32 %v2111_v4, %v2106_v2  ;;  %v2127_v10 = vld [vmem:[%s2089_s25 + $0x58] sm:$0xff]  ;;  %v368_v24 = vmax.f32 %v2106_v2, %v2111_v4  ;;  %v401_v49 = vand.u32 127, %v400_v45  ;;  %vm447_vm4 = vcmask 1043459   ;;  %s2315_s12 = scalar_lea.vmem [#allocation8], %s1383_s19 }
  0x34   : > { %v342_v8 = vadd.f32 %v2117_v6, %v2114_v5  ;;  %349 = vadd.xlane.f32.xlu1 %v348_v3  ;;  %v2130_v11 = vld [vmem:[%s2089_s25 + $0x10] sm:$0xff]  ;;  %v2133_v12 = vld [vmem:[%s2089_s25 + $0x18] sm:$0xff]  ;;  %v2136_v13 = vld [vmem:[%s2089_s25 + $0x60] sm:$0xff]  ;;  %v351_v15 = vadd.f32 %v2127_v10, %v2124_v9  ;;  %v383_v27 = vmax.f32 %v2124_v9, %v2127_v10  ;;  %v374_v29 = vmax.f32 %v2114_v5, %v2117_v6  ;;  %s1720_s19 = sshll.u32 %s2009_s6, 7  ;;  %s1288_s6 = sshll.u32 %s2315_s12, 4  ;;  %s1289_s6 = int_to_ptr.vmem [resolvable:$true] %s1288_s6 }
  0x35   : > { %337 = vadd.xlane.f32.xlu0 %v336_v7  ;;  %v2139_v14 = vld [vmem:[%s2089_s25 + $0x68] sm:$0xff]  ;;  %v339_v16 = vadd.f32 %v2133_v12, %v2130_v11  ;;  %v2148_v18 = vld [vmem:[%s2089_s25 + $0x70] sm:$0xff]  ;;  %v2151_v19 = vld [vmem:[%s2089_s25 + $0x78] sm:$0xff]  ;;  %v371_v26 = vmax.f32 %v2130_v11, %v2133_v12  ;;  %v403_v51 = vadd.s32 4294967288, %v401_v49  ;;  %v407_v55 = vadd.s32 4294967280, %v401_v49  ;;  %s1287_s18 = scalar_lea.hbm %s2385_s7, %s1720_s19  ;;  %s1275_s10 = scalar_lea.sflag [#allocation5], %s2083_s24 }
  0x36   : > { %343 = vadd.xlane.f32.xlu2 %v342_v8  ;;  %v354_v17 = vadd.f32 %v2139_v14, %v2136_v13  ;;  %v2154_v20 = vld [vmem:[%s2089_s25 + $0x30] sm:$0xff]  ;;  %v2157_v21 = vld [vmem:[%s2089_s25 + $0x38] sm:$0xff]  ;;  %v357_v22 = vadd.f32 %v2151_v19, %v2148_v18  ;;  %v386_v28 = vmax.f32 %v2136_v13, %v2139_v14  ;;  %v389_v31 = vmax.f32 %v2148_v18, %v2151_v19  ;;  %v453_v40 = vld [vmem:[%s2379_s1 + $0x8] sm:$0xff]  ;;  %s1290_s30 = sshll.u32 %s1287_s18, 4  ;;  %s1886_s25 = scalar_lea.hbm %s2385_s7, 256  ;;  %s1291_s30 = int_to_ptr.hbm [resolvable:$true] %s1290_s30 }
  0x37   : > { %v345_v23 = vadd.f32 %v2157_v21, %v2154_v20  ;;  %v377_v30 = vmax.f32 %v2154_v20, %v2157_v21  ;;  %v455_v35 = vld [vmem:[%s2379_s1 + $0x18] sm:$0xff]  ;;  %v454_v39 = vld [vmem:[%s2379_s1 + $0x10] sm:$0xff]  ;;  %v452_v41 = vld [vmem:[%s2379_s1] sm:$0xff]  ;;  %v411_v59 = vadd.s32 4294967272, %v401_v49  ;;  %vm450_vm5 = vcmask 1041408   ;;  %s1880_s11 = sshra.s32 %s1291_s30, 4  ;;  %s1881_s11 = int_to_ptr.hbm [resolvable:$true] %s1880_s11 }
  0x38   : > { %476 = vmatpush.msra.mxu0 %v455_v35  ;;  %vm460_vm6 = vcmask 261120   ;;  %vm490_vm7 = vcmask 64512   ;;  %s1882_s23 = scalar_lea.hbm %s1881_s11, 128  ;;  %p1887_p11 = scmp.lt.s32.totalorder %s1881_s11, %s2385_s7 }
  0x39   : > { %p1883_p1 = scmp.ne.s32.totalorder %s1881_s11, %s1882_s23  ;;  %p1888_p9 = scmp.lt.s32.totalorder %s1886_s25, %s1882_s23 }
  0x3a   : > { %477 = vmatpush.msra.mxu0 %v454_v39 }
  0x3b   : > { %p1884_p4 = pnand %p1883_p1, %p2055_p7  ;;  %p1889_p2 = por %p1888_p9, %p1887_p11 }
  0x3c   : > { %352 = vadd.xlane.f32.xlu1 %v351_v15  ;;  %478 = vmatpush.msra.mxu0 %v453_v40 }
  0x3d   : > { %340 = vadd.xlane.f32.xlu0 %v339_v16  ;;  %p1885_p8 = pneg %p1884_p4 }
  0x3e   : > { %355 = vadd.xlane.f32.xlu2 %v354_v17  ;;  %479 = vmatpush.msra.mxu0 %v452_v41 }
  0x3f   : > { %p1890_p10 = pnand %p1889_p2, %p1885_p8 }
  0x44   : > { %358 = vadd.xlane.f32.xlu1 %v357_v22 }
  0x45   : > { %346 = vadd.xlane.f32.xlu0 %v345_v23 }
  0x46   : > { %369 = vmax.xlane.f32.xlu2 %v368_v24 }
  0x4c   : > { %381 = vmax.xlane.f32.xlu1 %v380_v25 }
  0x4d   : > { %372 = vmax.xlane.f32.xlu0 %v371_v26 }
  0x4e   : > { %384 = vmax.xlane.f32.xlu2 %v383_v27 }
  0x54   : > { %387 = vmax.xlane.f32.xlu1 %v386_v28 }
  0x55   : > { %375 = vmax.xlane.f32.xlu0 %v374_v29 }
  0x56   : > { %378 = vmax.xlane.f32.xlu2 %v377_v30 }
  0x5d   : > { %390 = vmax.xlane.f32.xlu0 %v389_v31 }
  0xa7   : > { %v350_v32 = vpop.xlane.xlu1 %349 }
  0xa8   : > { %v338_v33 = vpop.xlane.xlu0 %337  ;;  %v364_v50 = vmul.f32 0.00390625, %v350_v32 }
  0xa9   : > { %v344_v34 = vpop.xlane.xlu2 %343  ;;  %v360_v54 = vmul.f32 0.00390625, %v338_v33 }
  0xaa   : > { %v415_v56 = vperm.slane %v364_v50, %v401_v49  ;;  %v362_v57 = vmul.f32 0.00390625, %v344_v34  ;;  %v1792_v50 = vld [vmem:[%s2380_s2] ss:$0 sm:$0xff] }
  0xab   : > { %v402_v7 = vperm.slane %v360_v54, %v401_v49  ;;  %v539_v54 = vshrl.u32 %v400_v45, 7 }
  0xac   : > { %v408_v23 = vperm.slane %v362_v57, %v407_v55 }
  0xad   : > { %1786 = vset.pattern.permute.xlu0 %v539_v54  ;;  %1784 = vset.pattern.permute.xlu1 %v539_v54 }
  0xaf   : > { %v353_v36 = vpop.xlane.xlu1 %352 }
  0xb0   : > { %v341_v37 = vpop.xlane.xlu0 %340  ;;  %v365_v52 = vmul.f32 0.00390625, %v353_v36 }
  0xb1   : > { %v356_v38 = vpop.xlane.xlu2 %355  ;;  %v361_v53 = vmul.f32 0.00390625, %v341_v37 }
  0xb2   : > { %v366_v58 = vmul.f32 0.00390625, %v356_v38  ;;  %v416_v61 = vperm.slane %v365_v52, %v403_v51 }
  0xb3   : > { %v404_v62 = vperm.slane %v361_v53, %v403_v51 }
  0xb4   : > { %v418_v24 = vperm.slane %v366_v58, %v407_v55  ;;  %v417_v27 = vsel %vm405_vm0, %v416_v61, %v415_v56  ;;  %v1793_v56 = vld [vmem:[%s2382_s4] ss:$0 sm:$0xff] }
  0xb5   : > { %v406_v28 = vsel %vm405_vm0, %v404_v62, %v402_v7 }
  0xb6   : > { %v419_v35 = vsel %vm409_vm1, %v418_v24, %v417_v27  ;;  %v410_v38 = vsel %vm409_vm1, %v408_v23, %v406_v28  ;;  %v552_v27 = vadd.s32 16, %v539_v54  ;;  %v558_v28 = vadd.s32 24, %v539_v54 }
  0xb7   : > { %v359_v42 = vpop.xlane.xlu1 %358 }
  0xb8   : > { %v347_v43 = vpop.xlane.xlu0 %346  ;;  %v367_v63 = vmul.f32 0.00390625, %v359_v42 }
  0xb9   : > { %v370_v44 = vpop.xlane.xlu2 %369  ;;  %v363_v3 = vmul.f32 0.00390625, %v347_v43 }
  0xba   : > { %v433_v8 = vperm.slane %v370_v44, %v401_v49  ;;  %v420_v29 = vperm.slane %v367_v63, %v411_v59 }
  0xbb   : > { %v412_v30 = vperm.slane %v363_v3, %v411_v59 }
  0xbc   : > { %v421_v41 = vsel %vm413_vm2, %v420_v29, %v419_v35  ;;  %v1447_v29 = vld [vmem:[#allocation6 + $0x70] sm:$0xf]  ;;  %v1702_v35 = vld [vmem:[#allocation6 + $0x174] sm:$0xf0] }
  0xbd   : > { %v414_v40 = vsel %vm413_vm2, %v412_v30, %v410_v38  ;;  %v1670_v30 = vld [vmem:[#allocation6 + $0x74] sm:$0xf0]  ;;  %v1639_v38 = vld [vmem:[#allocation6 + $0x1f0] sm:$0xf] }
  0xbf   : > { %v382_v47 = vpop.xlane.xlu1 %381 }
  0xc0   : > { %v373_v46 = vpop.xlane.xlu0 %372  ;;  %v440_v15 = vperm.slane %v382_v47, %v401_v49  ;;  %v485_v49 = vld [vmem:[%s2381_s3] sm:$0xff] }
  0xc1   : > { %v385_v48 = vpop.xlane.xlu2 %384  ;;  %v434_v16 = vperm.slane %v373_v46, %v403_v51  ;;  %v423_v46 = vsel %vm422_vm3, %v421_v41, %v414_v40  ;;  %509 = vmatpush.msra.mxu1 %v485_v49  ;;  %v1439_v40 = vld [vmem:[#allocation6 + $0x60] sm:$0xf] }
  0xc2   : > { %v441_v17 = vperm.slane %v385_v48, %v403_v51  ;;  %v1631_v49 = vld [vmem:[#allocation6 + $0x1e0] sm:$0xf] }
  0xc3   : > { %v435_v32 = vsel %vm405_vm0, %v434_v16, %v433_v8 }
  0xc4   : > { %v442_v33 = vsel %vm405_vm0, %v441_v17, %v440_v15 }
  0xc7   : > { %v388_v22 = vpop.xlane.xlu1 %387 }
  0xc8   : > { %v376_v60 = vpop.xlane.xlu0 %375  ;;  %v443_v31 = vperm.slane %v388_v22, %v407_v55 }
  0xc9   : > { %v436_v25 = vperm.slane %v376_v60, %v407_v55  ;;  %v379_v26 = vpop.xlane.xlu2 %378  ;;  %v546_v55 = vadd.s32 8, %v539_v54  ;;  %v1666_v54 = vld [vmem:[#allocation6 + $0x54] sm:$0xf0] }
  0xca   : > { %v438_v34 = vperm.slane %v379_v26, %v411_v59  ;;  %v444_v42 = vsel %vm409_vm1, %v443_v31, %v442_v33  ;;  %v1511_v31 = vld [vmem:[#allocation6 + $0xf0] sm:$0xf]  ;;  %v1686_v33 = vld [vmem:[#allocation6 + $0xf4] sm:$0xf0] }
  0xcb   : > { %v437_v36 = vsel %vm409_vm1, %v436_v25, %v435_v32  ;;  %1785 = vset.pattern.permute.xlu2 %v546_v55  ;;  %v1448_v32 = vor.u32 %v1670_v30, %v1447_v29  ;;  %v1415_v30 = vld [vmem:[#allocation6 + $0x30] sm:$0xf] }
  0xcc   : > { %v439_v43 = vsel %vm413_vm2, %v438_v34, %v437_v36  ;;  %v1575_v34 = vld [vmem:[#allocation6 + $0x170] sm:$0xf]  ;;  %v1512_v36 = vor.u32 %v1686_v33, %v1511_v31  ;;  %v1662_v31 = vld [vmem:[#allocation6 + $0x34] sm:$0xf0] }
  0xcd   : > { %1085 = vmatpush.bf16.msra.mxu2 %v1448_v32  ;;  %v1479_v32 = vld [vmem:[#allocation6 + $0xb0] sm:$0xf]  ;;  %v1416_v33 = vor.u32 %v1662_v31, %v1415_v30  ;;  %v1688_v30 = vld [vmem:[#allocation6 + $0x104] sm:$0xf0]  ;;  %v1583_v31 = vld [vmem:[#allocation6 + $0x180] sm:$0xf] }
  0xce   : > { %1098 = vmatpush.bf16.msra.mxu3 %v1512_v36  ;;  %v1543_v36 = vld [vmem:[#allocation6 + $0x130] sm:$0xf] }
  0xd0   : > { %v391_v37 = vpop.xlane.xlu0 %390 }
  0xd1   : > { %v445_v39 = vperm.slane %v391_v37, %v411_v59  ;;  %v1576_v37 = vor.u32 %v1702_v35, %v1575_v34  ;;  %v1678_v34 = vld [vmem:[#allocation6 + $0xb4] sm:$0xf0] }
  0xd2   : > { %v1480_v35 = vor.u32 %v1678_v34, %v1479_v32  ;;  %v1704_v32 = vld [vmem:[#allocation6 + $0x184] sm:$0xf0] }
  0xd3   : > { %v446_v44 = vsel %vm413_vm2, %v445_v39, %v444_v42  ;;  %v1718_v39 = vld [vmem:[#allocation6 + $0x1f4] sm:$0xf0]  ;;  %v1668_v42 = vld [vmem:[#allocation6 + $0x64] sm:$0xf0]  ;;  %1111 = vmatpush.bf16.msrb.mxu1 %v1576_v37 }
  0xd4   : > { %v448_v47 = vsel %vm447_vm4, %v446_v44, %v439_v43  ;;  %v1640_v41 = vor.u32 %v1718_v39, %v1639_v38  ;;  %v1503_v43 = vld [vmem:[#allocation6 + $0xe0] sm:$0xf]  ;;  %v1684_v44 = vld [vmem:[#allocation6 + $0xe4] sm:$0xf0]  ;;  %v1694_v37 = vld [vmem:[#allocation6 + $0x134] sm:$0xf0] }
  0xd5   : > { %v451_v48 = vsel %vm450_vm5, %v423_v46, %v448_v47  ;;  %v1440_v46 = vor.u32 %v1668_v42, %v1439_v40  ;;  %v1567_v47 = vld [vmem:[#allocation6 + $0x160] sm:$0xf]  ;;  %v1607_v38 = vld [vmem:[#allocation6 + $0x1b0] sm:$0xf]  ;;  %v1544_v39 = vor.u32 %v1694_v37, %v1543_v36  ;;  %v1710_v40 = vld [vmem:[#allocation6 + $0x1b4] sm:$0xf0] }
  0xd6   : > { %1386 = vmatmul.msk.f32.vlgmr.msra.gmra.mxu0 %vm460_vm6, %v451_v48  ;;  %v1700_v48 = vld [vmem:[#allocation6 + $0x164] sm:$0xf0]  ;;  %v1407_v42 = vld [vmem:[#allocation6 + $0x20] sm:$0xf]  ;;  %v1701_v37 = vld [vmem:[#allocation6 + $0x174] sm:$0xf] }
  0xd7   : > { %1124 = vmatpush.bf16.msrb.mxu0 %v1640_v41  ;;  %1086 = vmatpush.bf16.msra.mxu2 %v1440_v46  ;;  %v1608_v41 = vor.u32 %v1710_v40, %v1607_v38  ;;  %v1577_v38 = vld [vmem:[#allocation6 + $0x178] sm:$0xf0]  ;;  %vm1230_vm4 = vcmask 1040384  }
 0x153   : > { %v481_v51 = vpop.f32.mrf.mxu0 }
 0x154   : > { %v482_v52 = vadd.f32 %v1792_v50, %v481_v51  ;;  %v1504_v50 = vor.u32 %v1684_v44, %v1503_v43  ;;  %v1568_v51 = vor.u32 %v1700_v48, %v1567_v47  ;;  %v1660_v43 = vld [vmem:[#allocation6 + $0x24] sm:$0xf0]  ;;  %v1471_v44 = vld [vmem:[#allocation6 + $0xa0] sm:$0xf] }
 0x155   : > { %v1408_v46 = vor.u32 %v1660_v43, %v1407_v42  ;;  %v1676_v47 = vld [vmem:[#allocation6 + $0xa4] sm:$0xf0]  ;;  %v1580_v42 = vor.u32 %v1701_v37, %v1577_v38  ;;  %v1641_v43 = vld [vmem:[#allocation6 + $0x1f8] sm:$0xf0] }
 0x156   : > { %v484_v53 = vmax.f32 %v482_v52, 0.0  ;;  %v1716_v52 = vld [vmem:[#allocation6 + $0x1e4] sm:$0xf0]  ;;  %1099 = vmatpush.bf16.msra.mxu3 %v1504_v50  ;;  %1112 = vmatpush.bf16.msrb.mxu1 %v1568_v51  ;;  %v1472_v48 = vor.u32 %v1676_v47, %v1471_v44  ;;  %v1599_v51 = vld [vmem:[#allocation6 + $0x1a0] sm:$0xf] }
 0x157   : > { %v1632_v55 = vor.u32 %v1716_v52, %v1631_v49  ;;  %v1535_v49 = vld [vmem:[#allocation6 + $0x120] sm:$0xf]  ;;  %v1692_v50 = vld [vmem:[#allocation6 + $0x124] sm:$0xf0]  ;;  %v1667_v44 = vld [vmem:[#allocation6 + $0x64] sm:$0xf] }
 0x158   : > { %1387 = vmatmul.msk.f32.vlgmr.msra.gmra.mxu1 %vm490_vm7, %v484_v53  ;;  %v1431_v53 = vld [vmem:[#allocation6 + $0x50] sm:$0xf]  ;;  %v1536_v52 = vor.u32 %v1692_v50, %v1535_v49  ;;  %v1683_v50 = vld [vmem:[#allocation6 + $0xe4] sm:$0xf] }
 0x159   : > { %1125 = vmatpush.bf16.msrb.mxu0 %v1632_v55  ;;  %v1658_v55 = vld [vmem:[#allocation6 + $0x14] sm:$0xf0] }
 0x1d5   : > { %v511_v57 = vpop.f32.mrf.mxu1 }
 0x1d6   : > { %v512_v58 = vadd.f32 %v1793_v56, %v511_v57  ;;  %v1495_v56 = vld [vmem:[#allocation6 + $0xd0] sm:$0xf]  ;;  %v1682_v57 = vld [vmem:[#allocation6 + $0xd4] sm:$0xf0] }
 0x1d8   : > { %v515_v59 = vrot.slane %v512_v58, 2 }
 0x1da   : > { %v517_v60 = vadd.f32 %v515_v59, %v512_v58  ;;  %v1432_v58 = vor.u32 %v1666_v54, %v1431_v53  ;;  %v1496_v59 = vor.u32 %v1682_v57, %v1495_v56  ;;  %v1708_v53 = vld [vmem:[#allocation6 + $0x1a4] sm:$0xf0]  ;;  %v1399_v54 = vld [vmem:[#allocation6 + $0x10] sm:$0xf] }
 0x1db   : > { %v1600_v56 = vor.u32 %v1708_v53, %v1599_v51  ;;  %v1400_v57 = vor.u32 %v1658_v55, %v1399_v54  ;;  %v1505_v51 = vld [vmem:[#allocation6 + $0xe8] sm:$0xf0]  ;;  %v1699_v54 = vld [vmem:[#allocation6 + $0x164] sm:$0xf] }
 0x1dc   : > { %v1388_v61 = vmul.f32 -1.442695, %v517_v60  ;;  %1087 = vmatpush.bf16.msra.mxu2 %v1432_v58  ;;  %v1559_v60 = vld [vmem:[#allocation6 + $0x150] sm:$0xf]  ;;  %1100 = vmatpush.bf16.msra.mxu3 %v1496_v59  ;;  %v1674_v59 = vld [vmem:[#allocation6 + $0x94] sm:$0xf0]  ;;  %v1508_v53 = vor.u32 %v1683_v50, %v1505_v51 }
 0x1dd   : > { %v1463_v58 = vld [vmem:[#allocation6 + $0x90] sm:$0xf]  ;;  %v1569_v55 = vld [vmem:[#allocation6 + $0x168] sm:$0xf0]  ;;  %v1481_v50 = vld [vmem:[#allocation6 + $0xb8] sm:$0xf0] }
 0x1de   : > { %1794 = vpow2.f32 %v1388_v61  ;;  %v1698_v61 = vld [vmem:[#allocation6 + $0x154] sm:$0xf0] }
 0x1e4   : > { %v1795_v62 = vpop.eup %1794 }
 0x1e5   : > { %v521_v63 = vadd.f32 1.0, %v1795_v62  ;;  %v1623_v62 = vld [vmem:[#allocation6 + $0x1d0] sm:$0xf] }
 0x1e7   : > { %1796 = vrcp.f32 %v521_v63  ;;  %v533_v8 = vand.u32 2147483648, %v521_v63  ;;  %v531_v16 = vand.u32 2147483647, %v521_v63  ;;  %vm527_vm9 = vweird.f32 %v521_v63 }
 0x1e9   : > { %v534_v22 = vor.u32 1.1754944e-38, %v533_v8  ;;  %vm532_vm11 = vcmp.eq.f32.partialorder %v531_v16, 8.507059e+37  ;;  %v1664_v8 = vld [vmem:[#allocation6 + $0x44] sm:$0xf0] }
 0x1ed   : > { %v1797_v3 = vpop.eup %1796 }
 0x1ee   : > { %v523_v7 = vmul.f32 %v1797_v3, %v521_v63  ;;  %vm528_vm8 = vweird.f32 %v1797_v3  ;;  %v1560_v63 = vor.u32 %v1698_v61, %v1559_v60  ;;  %v1464_v60 = vor.u32 %v1674_v59, %v1463_v58 }
 0x1ef   : > { %vm529_vm10 = vmor %vm527_vm9, %vm528_vm8  ;;  %v1572_v59 = vor.u32 %v1699_v54, %v1569_v55  ;;  %v1693_v54 = vld [vmem:[#allocation6 + $0x134] sm:$0xf] }
 0x1f0   : > { %v524_v45 = vsub.f32 1.0, %v523_v7  ;;  %1113 = vmatpush.bf16.msrb.mxu1 %v1560_v63  ;;  %v1690_v63 = vld [vmem:[#allocation6 + $0x114] sm:$0xf0] }
 0x1f2   : > { %v525_v15 = vmul.f32 %v1797_v3, %v524_v45  ;;  %v1423_v45 = vld [vmem:[#allocation6 + $0x40] sm:$0xf] }
 0x1f3   : > { %v1424_v16 = vor.u32 %v1664_v8, %v1423_v45 }
 0x1f4   : > { %v526_v17 = vadd.f32 %v1797_v3, %v525_v15  ;;  %v1487_v15 = vld [vmem:[#allocation6 + $0xc0] sm:$0xf] }
 0x1f5   : > { %1088 = vmatpush.bf16.msra.mxu2 %v1424_v16  ;;  %v1656_v16 = vld [vmem:[#allocation6 + $0x4] sm:$0xf0] }
 0x1f6   : > { %v530_v23 = vsel %vm529_vm10, %v1797_v3, %v526_v17  ;;  %v1714_v3 = vld [vmem:[#allocation6 + $0x1d4] sm:$0xf0]  ;;  %v1680_v17 = vld [vmem:[#allocation6 + $0xc4] sm:$0xf0] }
 0x1f7   : > { %v535_v24 = vsel %vm532_vm11, %v534_v22, %v530_v23  ;;  %v1624_v7 = vor.u32 %v1714_v3, %v1623_v62  ;;  %v1488_v22 = vor.u32 %v1680_v17, %v1487_v15  ;;  %v1551_v23 = vld [vmem:[#allocation6 + $0x140] sm:$0xf]  ;;  %v1527_v62 = vld [vmem:[#allocation6 + $0x110] sm:$0xf] }
 0x1f8   : > { %v562_v25 = vperm.slane %v535_v24, 1  ;;  %v537_v26 = vperm.slane %v535_v24, 0  ;;  %v1696_v24 = vld [vmem:[#allocation6 + $0x144] sm:$0xf0]  ;;  %v1591_v3 = vld [vmem:[#allocation6 + $0x190] sm:$0xf]  ;;  %v1528_v45 = vor.u32 %v1690_v63, %v1527_v62 }
 0x1f9   : > { %1126 = vmatpush.bf16.msrb.mxu0 %v1624_v7  ;;  %1101 = vmatpush.bf16.msra.mxu3 %v1488_v22  ;;  %v1706_v7 = vld [vmem:[#allocation6 + $0x194] sm:$0xf0]  ;;  %v1391_v15 = vld [vmem:[#allocation6] sm:$0xf]  ;;  %v1672_v22 = vld [vmem:[#allocation6 + $0x84] sm:$0xf0] }
 0x1fa   : > { %567 = vperm.xlu0 %1786, %v562_v25   ;;  %548 = vperm.xlu2 %1785, %v537_v26   ;;  %v1592_v8 = vor.u32 %v1706_v7, %v1591_v3  ;;  %v1455_v17 = vld [vmem:[#allocation6 + $0x80] sm:$0xf]  ;;  %v1665_v62 = vld [vmem:[#allocation6 + $0x54] sm:$0xf]  ;;  %v1433_v63 = vld [vmem:[#allocation6 + $0x58] sm:$0xf0] }
 0x1fb   : > { %542 = vperm.xlu1 %1784, %v537_v26   ;;  %1089 = vmatpush.bf16.msra.mxu2 %v1416_v33  ;;  %v1392_v33 = vor.u32 %v1656_v16, %v1391_v15  ;;  %v1456_v34 = vor.u32 %v1672_v22, %v1455_v17  ;;  %v1681_v3 = vld [vmem:[#allocation6 + $0xd4] sm:$0xf]  ;;  %v1561_v16 = vld [vmem:[#allocation6 + $0x158] sm:$0xf0] }
 0x1fc   : > { %v1697_v15 = vld [vmem:[#allocation6 + $0x154] sm:$0xf] }
 0x1fd   : > { %1102 = vmatpush.bf16.msra.mxu3 %v1480_v35  ;;  %v1713_v17 = vld [vmem:[#allocation6 + $0x1d4] sm:$0xf] }
 0x1ff   : > { %1090 = vmatpush.bf16.msra.mxu2 %v1408_v46  ;;  %v1441_v46 = vld [vmem:[#allocation6 + $0x68] sm:$0xf0] }
 0x201   : > { %1103 = vmatpush.bf16.msra.mxu3 %v1472_v48 }
 0x202   : > { %573 = vperm.xlu2 %1785, %v562_v25   ;;  %1791 = vset.pattern.permute.xlu0 %v558_v28 }
 0x203   : > { %1787 = vset.pattern.permute.xlu1 %v552_v27  ;;  %1091 = vmatpush.bf16.msra.mxu2 %v1400_v57 }
 0x205   : > { %1104 = vmatpush.bf16.msra.mxu3 %v1464_v60 }
 0x207   : > { %1092 = vmatpush.bf16.msra.mxu2 %v1392_v33 }
 0x209   : > { %1105 = vmatpush.bf16.msra.mxu3 %v1456_v34  ;;  %v1695_v34 = vld [vmem:[#allocation6 + $0x144] sm:$0xf] }
 0x20a   : > { %1788 = vset.pattern.permute.xlu2 %v552_v27  ;;  %v1712_v27 = vld [vmem:[#allocation6 + $0x1c4] sm:$0xf0] }
 0x20b   : > { %554 = vperm.xlu1 %1787, %v537_v26  }
 0x212   : > { %579 = vperm.xlu2 %1788, %v562_v25  }
 0x213   : > { %1789 = vset.pattern.permute.xlu1 %v558_v28 }
 0x21a   : > { %1790 = vset.pattern.permute.xlu2 %v558_v28 }
 0x21b   : > { %560 = vperm.xlu1 %1789, %v537_v26   ;;  %v1552_v26 = vor.u32 %v1696_v24, %v1551_v23  ;;  %v1669_v23 = vld [vmem:[#allocation6 + $0x74] sm:$0xf]  ;;  %v1449_v24 = vld [vmem:[#allocation6 + $0x78] sm:$0xf0] }
 0x21c   : > { %v1452_v35 = vor.u32 %v1669_v23, %v1449_v24  ;;  %v1625_v24 = vld [vmem:[#allocation6 + $0x1d8] sm:$0xf0] }
 0x21d   : > { %1114 = vmatpush.bf16.msrb.mxu1 %v1552_v26  ;;  %v1513_v26 = vld [vmem:[#allocation6 + $0xf8] sm:$0xf0] }
 0x21e   : > { %1137 = vmatpush.bf16.msrb.mxu2 %v1452_v35  ;;  %v1553_v35 = vld [vmem:[#allocation6 + $0x148] sm:$0xf0] }
 0x221   : > { %1115 = vmatpush.bf16.msrb.mxu1 %v1544_v39  ;;  %v1717_v39 = vld [vmem:[#allocation6 + $0x1f4] sm:$0xf] }
 0x222   : > { %585 = vperm.xlu2 %1790, %v562_v25   ;;  %v1615_v25 = vld [vmem:[#allocation6 + $0x1c0] sm:$0xf]  ;;  %v1644_v49 = vor.u32 %v1717_v39, %v1641_v43 }
 0x223   : > { %v1616_v29 = vor.u32 %v1712_v27, %v1615_v25  ;;  %v1685_v25 = vld [vmem:[#allocation6 + $0xf4] sm:$0xf]  ;;  %v1519_v27 = vld [vmem:[#allocation6 + $0x100] sm:$0xf] }
 0x224   : > { %v1516_v36 = vor.u32 %v1685_v25, %v1513_v26  ;;  %v1520_v40 = vor.u32 %v1688_v30, %v1519_v27  ;;  %v1663_v25 = vld [vmem:[#allocation6 + $0x44] sm:$0xf]  ;;  %v1425_v26 = vld [vmem:[#allocation6 + $0x48] sm:$0xf0]  ;;  %v1564_v27 = vor.u32 %v1697_v15, %v1561_v16 }
 0x225   : > { %1127 = vmatpush.bf16.msrb.mxu0 %v1616_v29  ;;  %1116 = vmatpush.bf16.msrb.mxu1 %v1536_v52  ;;  %v1444_v52 = vor.u32 %v1667_v44, %v1441_v46  ;;  %v1489_v30 = vld [vmem:[#allocation6 + $0xc8] sm:$0xf0]  ;;  %v1428_v33 = vor.u32 %v1663_v25, %v1425_v26  ;;  %v1556_v44 = vor.u32 %v1695_v34, %v1553_v35  ;;  %v1661_v46 = vld [vmem:[#allocation6 + $0x34] sm:$0xf]  ;;  %v1691_v16 = vld [vmem:[#allocation6 + $0x124] sm:$0xf] }
 0x226   : > { %1150 = vmatpush.bf16.msrb.mxu3 %v1516_v36  ;;  %v1473_v15 = vld [vmem:[#allocation6 + $0xa8] sm:$0xf0] }
 0x227   : > { %1138 = vmatpush.bf16.msrb.mxu2 %v1444_v52 }
 0x229   : > { %1128 = vmatpush.bf16.msrb.mxu0 %v1608_v41  ;;  %1117 = vmatpush.bf16.msrb.mxu1 %v1528_v45  ;;  %v1584_v41 = vor.u32 %v1704_v32, %v1583_v31  ;;  %v1497_v45 = vld [vmem:[#allocation6 + $0xd8] sm:$0xf0]  ;;  %v1628_v32 = vor.u32 %v1713_v17, %v1625_v24  ;;  %v1537_v17 = vld [vmem:[#allocation6 + $0x128] sm:$0xf0] }
 0x22a   : > { %1151 = vmatpush.bf16.msrb.mxu3 %v1508_v53  ;;  %v1540_v35 = vor.u32 %v1691_v16, %v1537_v17 }
 0x22d   : > { %1129 = vmatpush.bf16.msrb.mxu0 %v1600_v56  ;;  %v1715_v56 = vld [vmem:[#allocation6 + $0x1e4] sm:$0xf]  ;;  %1118 = vmatpush.bf16.msrb.mxu1 %v1520_v40 }
 0x22e   : > { %v1711_v40 = vld [vmem:[#allocation6 + $0x1c4] sm:$0xf] }
 0x231   : > { %1130 = vmatpush.bf16.msrb.mxu0 %v1592_v8  ;;  %1163 = vmatpush.bf16.msra.mxu1 %v1580_v42  ;;  %v1436_v8 = vor.u32 %v1665_v62, %v1433_v63 }
 0x233   : > { %1139 = vmatpush.bf16.msrb.mxu2 %v1436_v8 }
 0x235   : > { %1131 = vmatpush.bf16.msrb.mxu0 %v1584_v41  ;;  %1164 = vmatpush.bf16.msra.mxu1 %v1572_v59  ;;  %v1617_v41 = vld [vmem:[#allocation6 + $0x1c8] sm:$0xf0]  ;;  %v1709_v59 = vld [vmem:[#allocation6 + $0x1b4] sm:$0xf] }
 0x237   : > { %1140 = vmatpush.bf16.msrb.mxu2 %v1428_v33 }
 0x239   : > { %1176 = vmatpush.bf16.msra.mxu0 %v1644_v49  ;;  %1165 = vmatpush.bf16.msra.mxu1 %v1564_v27  ;;  %v1677_v49 = vld [vmem:[#allocation6 + $0xb4] sm:$0xf] }
 0x23d   : > { %1166 = vmatpush.bf16.msra.mxu1 %v1556_v44 }
 0x254   : > { %v2215_v28 = vpop.permute.xlu2 %548 }
 0x25c   : > { %v2217_v61 = vpop.permute.xlu2 %573 }
 0x25d   : > { %v2224_v57 = vmul.f32 %v2217_v61, %v2124_v9  ;;  %v2233_v9 = vmul.f32 %v2217_v61, %v2127_v10 }
 0x26c   : > { %v568_v29 = vpop.permute.xlu0 %567  ;;  %v580_v48 = vpop.permute.xlu2 %579 }
 0x26d   : > { %v2220_v47 = vmul.f32 %v568_v29, %v2100_v0  ;;  %v1633_v0 = vld [vmem:[#allocation6 + $0x1e8] sm:$0xf0]  ;;  %v2227_v58 = vmul.f32 %v568_v29, %v2103_v1  ;;  %v1500_v1 = vor.u32 %v1681_v3, %v1497_v45  ;;  %v2236_v22 = vmul.f32 %v580_v48, %v2136_v13  ;;  %v1679_v29 = vld [vmem:[#allocation6 + $0xc4] sm:$0xf]  ;;  %v543_v36 = vpop.permute.xlu1 %542 }
 0x26e   : > { %v1636_v60 = vor.u32 %v1715_v56, %v1633_v0  ;;  %v2239_v23 = vmul.f32 %v580_v48, %v2139_v14  ;;  %v1492_v39 = vor.u32 %v1679_v29, %v1489_v30  ;;  %v1417_v48 = vld [vmem:[#allocation6 + $0x38] sm:$0xf0]  ;;  %v1484_v56 = vor.u32 %v1677_v49, %v1481_v50  ;;  %v1659_v3 = vld [vmem:[#allocation6 + $0x24] sm:$0xf]  ;;  %v1457_v50 = vld [vmem:[#allocation6 + $0x88] sm:$0xf0] }
 0x26f   : > { %v657_v7 = vadd.f32 %v2224_v57, %v2220_v47  ;;  %v621_v10 = vmax.f32 %v2220_v47, %v2224_v57  ;;  %v666_v61 = vadd.f32 %v2233_v9, %v2227_v58  ;;  %v630_v13 = vmax.f32 %v2227_v58, %v2233_v9  ;;  %1152 = vmatpush.bf16.msrb.mxu3 %v1500_v1  ;;  %v1545_v0 = vld [vmem:[#allocation6 + $0x138] sm:$0xf0]  ;;  %v1675_v45 = vld [vmem:[#allocation6 + $0xa4] sm:$0xf] }
 0x270   : > { %1177 = vmatpush.bf16.msra.mxu0 %v1636_v60  ;;  %v1420_v55 = vor.u32 %v1661_v46, %v1417_v48  ;;  %v1609_v60 = vld [vmem:[#allocation6 + $0x1b8] sm:$0xf0]  ;;  %v1548_v8 = vor.u32 %v1693_v54, %v1545_v0  ;;  %v2266_v27 = vmul.f32 %v543_v36, %v2106_v2  ;;  %v2269_v29 = vmul.f32 %v543_v36, %v2111_v4  ;;  %v1705_v46 = vld [vmem:[#allocation6 + $0x194] sm:$0xf]  ;;  %v1655_v49 = vld [vmem:[#allocation6 + $0x4] sm:$0xf] }
 0x271   : > { %v658_v14 = vadd.f32 %v657_v7, %v2236_v22  ;;  %v667_v42 = vadd.f32 %v666_v61, %v2239_v23  ;;  %v631_v51 = vmax.f32 %v630_v13, %v2239_v23  ;;  %v1409_v7 = vld [vmem:[#allocation6 + $0x28] sm:$0xf0]  ;;  %v1612_v1 = vor.u32 %v1709_v59, %v1609_v60  ;;  %v1593_v48 = vld [vmem:[#allocation6 + $0x198] sm:$0xf0]  ;;  %v1687_v54 = vld [vmem:[#allocation6 + $0x104] sm:$0xf] }
 0x272   : > { %1141 = vmatpush.bf16.msrb.mxu2 %v1420_v55  ;;  %v1412_v26 = vor.u32 %v1659_v3, %v1409_v7  ;;  %v2263_v61 = vmul.f32 %v2215_v28, %v2130_v11  ;;  %v1476_v30 = vor.u32 %v1675_v45, %v1473_v15  ;;  %v1601_v13 = vld [vmem:[#allocation6 + $0x1a8] sm:$0xf0]  ;;  %1167 = vmatpush.bf16.msra.mxu1 %v1548_v8  ;;  %v1673_v11 = vld [vmem:[#allocation6 + $0x94] sm:$0xf]  ;;  %v1703_v3 = vld [vmem:[#allocation6 + $0x184] sm:$0xf] }
 0x273   : > { %1153 = vmatpush.bf16.msrb.mxu3 %v1492_v39  ;;  %v1465_v39 = vld [vmem:[#allocation6 + $0x98] sm:$0xf0]  ;;  %v1596_v59 = vor.u32 %v1705_v46, %v1593_v48  ;;  %v1521_v60 = vld [vmem:[#allocation6 + $0x108] sm:$0xf0] }
 0x274   : > { %1178 = vmatpush.bf16.msra.mxu0 %v1628_v32  ;;  %v2273_v32 = vmul.f32 %v2215_v28, %v2133_v12  ;;  %v1468_v28 = vor.u32 %v1673_v11, %v1465_v39  ;;  %v1585_v7 = vld [vmem:[#allocation6 + $0x188] sm:$0xf0] }
 0x276   : > { %1142 = vmatpush.bf16.msrb.mxu2 %v1412_v26  ;;  %1168 = vmatpush.bf16.msra.mxu1 %v1540_v35  ;;  %v648_v55 = vadd.f32 %v2273_v32, %v2269_v29 }
 0x277   : > { %1154 = vmatpush.bf16.msrb.mxu3 %v1484_v56 }
 0x27b   : > { %1155 = vmatpush.bf16.msrb.mxu3 %v1476_v30  ;;  %v1588_v30 = vor.u32 %v1703_v3, %v1585_v7 }
 0x27c   : > { %v586_v31 = vpop.permute.xlu2 %585 }
 0x27d   : > { %v2249_v37 = vmul.f32 %v586_v31, %v2148_v18  ;;  %v2252_v38 = vmul.f32 %v586_v31, %v2151_v19  ;;  %v1620_v18 = vor.u32 %v1711_v40, %v1617_v41  ;;  %v622_v19 = vmax.f32 %v621_v10, %v2236_v22  ;;  %v555_v25 = vpop.permute.xlu1 %554  ;;  %v1707_v10 = vld [vmem:[#allocation6 + $0x1a4] sm:$0xf]  ;;  %v1401_v31 = vld [vmem:[#allocation6 + $0x18] sm:$0xf0]  ;;  %v1689_v41 = vld [vmem:[#allocation6 + $0x114] sm:$0xf] }
 0x27e   : > { %v2276_v2 = vmul.f32 %v555_v25, %v2114_v5  ;;  %v2279_v4 = vmul.f32 %v555_v25, %v2117_v6  ;;  %v1604_v36 = vor.u32 %v1707_v10, %v1601_v13  ;;  %v612_v5 = vmax.f32 %v2269_v29, %v2273_v32  ;;  %v1393_v6 = vld [vmem:[#allocation6 + $0x8] sm:$0xf0] }
 0x27f   : > { %v659_v43 = vadd.f32 %v658_v14, %v2249_v37  ;;  %v668_v53 = vadd.f32 %v667_v42, %v2252_v38  ;;  %v623_v62 = vmax.f32 %v622_v19, %v2249_v37  ;;  %v632_v63 = vmax.f32 %v631_v51, %v2252_v38  ;;  %1179 = vmatpush.bf16.msra.mxu0 %v1620_v18  ;;  %v1657_v14 = vld [vmem:[#allocation6 + $0x14] sm:$0xf]  ;;  %v1529_v42 = vld [vmem:[#allocation6 + $0x118] sm:$0xf0]  ;;  %v1671_v18 = vld [vmem:[#allocation6 + $0x84] sm:$0xf] }
 0x280   : > { %v1404_v12 = vor.u32 %v1657_v14, %v1401_v31  ;;  %v639_v19 = vadd.f32 %v2263_v61, %v2266_v27  ;;  %v613_v0 = vmax.f32 %v612_v5, %v2279_v4  ;;  %1156 = vmatpush.bf16.msrb.mxu3 %v1468_v28  ;;  %v649_v16 = vadd.f32 %v648_v55, %v2279_v4 }
 0x281   : > { %v660_v52 = vrot.slane %v659_v43, 4  ;;  %v669_v24 = vrot.slane %v668_v53, 4  ;;  %v624_v33 = vrot.slane %v623_v62, 4  ;;  %v633_v34 = vrot.slane %v632_v63, 4 }
 0x282   : > { %1143 = vmatpush.bf16.msrb.mxu2 %v1404_v12  ;;  %v640_v15 = vadd.f32 %v639_v19, %v2276_v2  ;;  %v1524_v10 = vor.u32 %v1687_v54, %v1521_v60 }
 0x283   : > { %v661_v40 = vadd.f32 %v660_v52, %v659_v43  ;;  %1180 = vmatpush.bf16.msra.mxu0 %v1612_v1  ;;  %v670_v44 = vadd.f32 %v669_v24, %v668_v53  ;;  %v603_v43 = vmax.f32 %v2266_v27, %v2263_v61  ;;  %v625_v51 = vmax.f32 %v623_v62, %v624_v33 }
 0x284   : > { %v634_v52 = vmax.f32 %v632_v63, %v633_v34  ;;  %v1532_v53 = vor.u32 %v1689_v41, %v1529_v42  ;;  %v1396_v62 = vor.u32 %v1655_v49, %v1393_v6  ;;  %v1460_v63 = vor.u32 %v1671_v18, %v1457_v50 }
 0x285   : > { %v604_v56 = vmax.f32 %v603_v43, %v2276_v2  ;;  %v662_v45 = vrot.slane %v661_v40, 2  ;;  %v671_v8 = vrot.slane %v670_v44, 2  ;;  %v626_v25 = vrot.slane %v625_v51, 2 }
 0x286   : > { %v635_v26 = vrot.slane %v634_v52, 2  ;;  %1169 = vmatpush.bf16.msra.mxu1 %v1532_v53  ;;  %1144 = vmatpush.bf16.msrb.mxu2 %v1396_v62 }
 0x287   : > { %1181 = vmatpush.bf16.msra.mxu0 %v1604_v36  ;;  %v663_v34 = vadd.f32 %v662_v45, %v661_v40  ;;  %1157 = vmatpush.bf16.msrb.mxu3 %v1460_v63  ;;  %v627_v36 = vmax.f32 %v625_v51, %v626_v25 }
 0x288   : > { %v636_v41 = vmax.f32 %v634_v52, %v635_v26 }
 0x289   : > { %v664_v48 = vrot.slane %v663_v34, 1  ;;  %v628_v6 = vrot.slane %v627_v36, 1 }
 0x28a   : > { %1170 = vmatpush.bf16.msra.mxu1 %v1524_v10  ;;  %v637_v18 = vrot.slane %v636_v41, 1 }
 0x28b   : > { %1182 = vmatpush.bf16.msra.mxu0 %v1596_v59  ;;  %v665_v51 = vadd.f32 %v664_v48, %v663_v34  ;;  %v629_v60 = vmax.f32 %v627_v36, %v628_v6 }
 0x28c   : > { %v638_v3 = vmax.f32 %v636_v41, %v637_v18 }
 0x28d   : > { %v561_v1 = vpop.permute.xlu1 %560  ;;  %v677_v62 = vmul.f32 0.03125, %v665_v51 }
 0x28e   : > { %v2294_v17 = vmul.f32 %v561_v1, %v2154_v20  ;;  %v2297_v24 = vmul.f32 %v561_v1, %v2157_v21  ;;  %v672_v20 = vadd.f32 %v671_v8, %v670_v44 }
 0x28f   : > { %1183 = vmatpush.bf16.msra.mxu0 %v1588_v30 }
 0x290   : > { %v605_v13 = vmax.f32 %v604_v56, %v2294_v17  ;;  %v614_v14 = vmax.f32 %v613_v0, %v2297_v24  ;;  %v641_v31 = vadd.f32 %v640_v15, %v2294_v17  ;;  %v650_v33 = vadd.f32 %v649_v16, %v2297_v24 }
 0x291   : > { %v673_v49 = vrot.slane %v672_v20, 1 }
 0x292   : > { %v606_v21 = vrot.slane %v605_v13, 4  ;;  %v615_v35 = vrot.slane %v614_v14, 4  ;;  %v642_v11 = vrot.slane %v641_v31, 4  ;;  %v651_v39 = vrot.slane %v650_v33, 4 }
 0x293   : > { %v674_v52 = vadd.f32 %v673_v49, %v672_v20 }
 0x294   : > { %v607_v42 = vmax.f32 %v605_v13, %v606_v21  ;;  %v616_v12 = vmax.f32 %v614_v14, %v615_v35  ;;  %v643_v28 = vadd.f32 %v642_v11, %v641_v31  ;;  %v652_v46 = vadd.f32 %v651_v39, %v650_v33 }
 0x295   : > { %v678_v63 = vmul.f32 0.03125, %v674_v52  ;;  %v764_v21 = vstv %s763_s13 }
 0x296   : > { %v608_v43 = vrot.slane %v607_v42, 2  ;;  %v617_v5 = vrot.slane %v616_v12, 2  ;;  %v644_v40 = vrot.slane %v643_v28, 2  ;;  %v653_v44 = vrot.slane %v652_v46, 2 }
 0x298   : > { %v645_v50 = vadd.f32 %v644_v40, %v643_v28  ;;  %v654_v19 = vadd.f32 %v653_v44, %v652_v46  ;;  %v609_v53 = vmax.f32 %v607_v42, %v608_v43  ;;  %v618_v54 = vmax.f32 %v616_v12, %v617_v5 }
 0x29a   : > { %v646_v55 = vrot.slane %v645_v50, 1  ;;  %v655_v56 = vrot.slane %v654_v19, 1  ;;  %v610_v0 = vrot.slane %v609_v53, 1  ;;  %v619_v59 = vrot.slane %v618_v54, 1 }
 0x29c   : > { %v611_v7 = vmax.f32 %v609_v53, %v610_v0  ;;  %v620_v45 = vmax.f32 %v618_v54, %v619_v59  ;;  %v647_v8 = vadd.f32 %v646_v55, %v645_v50  ;;  %v656_v1 = vadd.f32 %v655_v56, %v654_v19 }
 0x29e   : > { %v683_v15 = vsel %vm422_vm3, %v629_v60, %v611_v7  ;;  %v684_v16 = vsel %vm422_vm3, %v638_v3, %v620_v45  ;;  %v675_v25 = vmul.f32 0.03125, %v647_v8  ;;  %v676_v26 = vmul.f32 0.03125, %v656_v1 }
 0x29f   : > { %v695_v10 = vpack.c.bf16 %v683_v15, %v683_v15  ;;  %v696_v30 = vpack.c.bf16 %v684_v16, %v684_v16 }
 0x2a0   : > { %v691_v13 = vsel %vm422_vm3, %v677_v62, %v675_v25  ;;  %v692_v14 = vsel %vm422_vm3, %v678_v63, %v676_v26 }
 0x2a1   : > { %1093 = vmatmul.bf16.vlgmr.msra.gmra.mxu2 %v695_v10  ;;  %1106 = vmatmul.bf16.vlgmr.msra.gmra.mxu3 %v696_v30  ;;  %v697_v31 = vpack.c.bf16 %v691_v13, %v691_v13  ;;  %v698_v33 = vpack.c.bf16 %v692_v14, %v692_v14 }
 0x2a3   : > { %1119 = vmatmul.bf16.vlgmr.msrb.gmra.mxu1 %v697_v31  ;;  %1132 = vmatmul.bf16.vlgmr.msrb.gmra.mxu0 %v698_v33 }
 0x2b1   : > { %1145 = vmatmul.bf16.vlgmr.msrb.gmra.mxu2 %v695_v10  ;;  %1158 = vmatmul.bf16.vlgmr.msrb.gmra.mxu3 %v696_v30 }
 0x2b3   : > { %1171 = vmatmul.bf16.vlgmr.msra.gmra.mxu1 %v697_v31  ;;  %1184 = vmatmul.bf16.vlgmr.msra.gmra.mxu0 %v698_v33 }
 0x320   : > { %v1120_v34 = vpop.f32.mrf.mxu1  ;;  %v1133_v20 = vpop.f32.mrf.mxu0 }
 0x324   : > { %v1094_v35 = vpop.f32.mrf.mxu2  ;;  %v1107_v11 = vpop.f32.mrf.mxu3 }
 0x325   : > { %v1095_v39 = vadd.f32 %v1094_v35, %v764_v21 }
 0x327   : > { %v1108_v36 = vadd.f32 %v1107_v11, %v1095_v39 }
 0x328   : > { %v1122_v41 = vpop.f32.mrf.mxu1  ;;  %v1135_v42 = vpop.f32.mrf.mxu0 }
 0x329   : > { %v1121_v12 = vadd.f32 %v1120_v34, %v1108_v36 }
 0x32b   : > { %v1134_v28 = vadd.f32 %v1133_v20, %v1121_v12 }
 0x32c   : > { %v1096_v46 = vpop.f32.mrf.mxu2  ;;  %v1109_v48 = vpop.f32.mrf.mxu3 }
 0x32d   : > { %v1645_v49 = vmul.f32 -1.442695, %v1134_v28 }
 0x32f   : > { %1798 = vpow2.f32 %v1645_v49 }
 0x330   : > { %v1172_v43 = vpop.f32.mrf.mxu1  ;;  %v1185_v5 = vpop.f32.mrf.mxu0 }
 0x334   : > { %v1146_v40 = vpop.f32.mrf.mxu2  ;;  %v1159_v44 = vpop.f32.mrf.mxu3 }
 0x335   : > { %v1147_v6 = vadd.f32 %v1146_v40, %v764_v21  ;;  %v1799_v18 = vpop.eup %1798 }
 0x336   : > { %v1195_v51 = vadd.f32 1.0, %v1799_v18 }
 0x337   : > { %v1160_v50 = vadd.f32 %v1159_v44, %v1147_v6 }
 0x338   : > { %v1174_v19 = vpop.f32.mrf.mxu1  ;;  %v1187_v53 = vpop.f32.mrf.mxu0  ;;  %1800 = vrcp.f32 %v1195_v51  ;;  %vm1202_vm14 = vweird.f32 %v1195_v51  ;;  %v1208_v10 = vand.u32 2147483648, %v1195_v51  ;;  %v1206_v30 = vand.u32 2147483647, %v1195_v51 }
 0x339   : > { %v1173_v54 = vadd.f32 %v1172_v43, %v1160_v50 }
 0x33a   : > { %v1209_v34 = vor.u32 1.1754944e-38, %v1208_v10  ;;  %vm1207_vm5 = vcmp.eq.f32.partialorder %v1206_v30, 8.507059e+37 }
 0x33b   : > { %v1186_v52 = vadd.f32 %v1185_v5, %v1173_v54 }
 0x33c   : > { %v1148_v55 = vpop.f32.mrf.mxu2  ;;  %v1161_v56 = vpop.f32.mrf.mxu3 }
 0x33d   : > { %v1646_v0 = vmul.f32 -1.442695, %v1186_v52 }
 0x33e   : > { %v1801_v59 = vpop.eup %1800 }
 0x33f   : > { %1802 = vpow2.f32 %v1646_v0  ;;  %v1198_v7 = vmul.f32 %v1801_v59, %v1195_v51  ;;  %vm1203_vm12 = vweird.f32 %v1801_v59 }
 0x340   : > { %vm1204_vm15 = vmor %vm1202_vm14, %vm1203_vm12 }
 0x341   : > { %v1199_v45 = vsub.f32 1.0, %v1198_v7 }
 0x343   : > { %v1200_v1 = vmul.f32 %v1801_v59, %v1199_v45 }
 0x345   : > { %v1803_v60 = vpop.eup %1802  ;;  %v1201_v16 = vadd.f32 %v1801_v59, %v1200_v1 }
 0x346   : > { %v1196_v3 = vadd.f32 1.0, %v1803_v60 }
 0x347   : > { %v1205_v31 = vsel %vm1204_vm15, %v1801_v59, %v1201_v16 }
 0x348   : > { %1804 = vrcp.f32 %v1196_v3  ;;  %v1223_v15 = vand.u32 2147483648, %v1196_v3  ;;  %v1221_v26 = vand.u32 2147483647, %v1196_v3  ;;  %vm1217_vm0 = vweird.f32 %v1196_v3 }
 0x349   : > { %v1210_v35 = vsel %vm1207_vm5, %v1209_v34, %v1205_v31 }
 0x34a   : > { %v1224_v14 = vor.u32 1.1754944e-38, %v1223_v15  ;;  %vm1222_vm2 = vcmp.eq.f32.partialorder %v1221_v26, 8.507059e+37 }
 0x34e   : > { %v1805_v8 = vpop.eup %1804 }
 0x34f   : > { %v1213_v62 = vmul.f32 %v1805_v8, %v1196_v3  ;;  %vm1218_vm13 = vweird.f32 %v1805_v8 }
 0x350   : > { %vm1219_vm1 = vmor %vm1217_vm0, %vm1218_vm13 }
 0x351   : > { %v1214_v63 = vsub.f32 1.0, %v1213_v62 }
 0x353   : > { %v1215_v25 = vmul.f32 %v1805_v8, %v1214_v63 }
 0x355   : > { %v1216_v13 = vadd.f32 %v1805_v8, %v1215_v25 }
 0x357   : > { %v1220_v33 = vsel %vm1219_vm1, %v1805_v8, %v1216_v13 }
 0x358   : > { %v1225_v20 = vsel %vm1222_vm2, %v1224_v14, %v1220_v33 }
 0x359   : > { %v1229_v21 = vrot.slane %v1225_v20, 7 }
 0x35b   : > { %v1231_v11 = vsel %vm1230_vm4, %v1210_v35, %v1229_v21  ;;  %v1232_v39 = vsel %vm422_vm3, %v1210_v35, %v1229_v21 }
 0x35c   : > { %v1233_v36 = vrot.slane %v1232_v39, 1  ;;  %v1234_v41 = vperm.slane %v1231_v11, 0  ;;  %v1235_v42 = vperm.slane %v1231_v11, 1 }
 0x35e   : > { %v1242_v12 = vmul.f32 %v1234_v41, %v2266_v27  ;;  %v1243_v28 = vmul.f32 %v1235_v42, %v2269_v29  ;;  %v1244_v46 = vmul.f32 %v1234_v41, %v2263_v61  ;;  %v1245_v48 = vmul.f32 %v1235_v42, %v2273_v32 }
 0x35f   : > { %v1236_v49 = vperm.slane %v1233_v36, 0  ;;  %v1246_v43 = vmul.f32 %v1234_v41, %v2276_v2  ;;  %v1237_v27 = vperm.slane %v1233_v36, 1  ;;  %v1247_v61 = vmul.f32 %v1235_v42, %v2279_v4 }
 0x360   : > { %1258 = vst [vmem:[%s2315_s12] sm:$0xff] %v1242_v12  ;;  %v1248_v29 = vmul.f32 %v1234_v41, %v2294_v17  ;;  %v1249_v32 = vmul.f32 %v1235_v42, %v2297_v24 }
 0x361   : > { %1259 = vst [vmem:[%s2315_s12 + $0x8] sm:$0xff] %v1243_v28  ;;  %v1250_v2 = vmul.f32 %v1236_v49, %v2220_v47  ;;  %v1251_v5 = vmul.f32 %v1237_v27, %v2227_v58  ;;  %v1252_v4 = vmul.f32 %v1236_v49, %v2224_v57  ;;  %v1253_v17 = vmul.f32 %v1237_v27, %v2233_v9 }
 0x362   : > { %1260 = vst [vmem:[%s2315_s12 + $0x10] sm:$0xff] %v1244_v46  ;;  %v1254_v47 = vmul.f32 %v1236_v49, %v2236_v22  ;;  %v1255_v58 = vmul.f32 %v1237_v27, %v2239_v23  ;;  %v1256_v57 = vmul.f32 %v1236_v49, %v2249_v37  ;;  %v1257_v24 = vmul.f32 %v1237_v27, %v2252_v38 }
 0x363   : > { %1261 = vst [vmem:[%s2315_s12 + $0x18] sm:$0xff] %v1245_v48 }
 0x364   : > { %1262 = vst [vmem:[%s2315_s12 + $0x20] sm:$0xff] %v1246_v43 }
 0x365   : > { %1263 = vst [vmem:[%s2315_s12 + $0x28] sm:$0xff] %v1247_v61 }
 0x366   : > { %1264 = vst [vmem:[%s2315_s12 + $0x30] sm:$0xff] %v1248_v29 }
 0x367   : > { %1265 = vst [vmem:[%s2315_s12 + $0x38] sm:$0xff] %v1249_v32 }
 0x368   : > { %1266 = vst [vmem:[%s2315_s12 + $0x40] sm:$0xff] %v1250_v2 }
 0x369   : > { %1267 = vst [vmem:[%s2315_s12 + $0x48] sm:$0xff] %v1251_v5 }
 0x36a   : > { %1268 = vst [vmem:[%s2315_s12 + $0x50] sm:$0xff] %v1252_v4 }
 0x36b   : > { %1269 = vst [vmem:[%s2315_s12 + $0x58] sm:$0xff] %v1253_v17 }
 0x36c   : > { %1270 = vst [vmem:[%s2315_s12 + $0x60] sm:$0xff] %v1254_v47 }
 0x36d   : > { %1271 = vst [vmem:[%s2315_s12 + $0x68] sm:$0xff] %v1255_v58 }
 0x36e   : > { %1272 = vst [vmem:[%s2315_s12 + $0x70] sm:$0xff] %v1256_v57 }
 0x36f   : > { %1273 = vst [vmem:[%s2315_s12 + $0x78] sm:$0xff] %v1257_v24 }
 0x370   : > { %1893 = shalt.err (!%p1890_p10)
}
 0x371   : > { %s1943_s24 = smov 256   ;;  %s1944_s12 = smov 16  }
 0x372   : > { %1727 = dma.vmem_to_hbm [thread:$0]  (%p2055_p7), %s1289_s6, 2048, %s1291_s30, %s1275_s10, %s1943_s24, %s1943_s24, %s1944_s12  }
 0x373 PF: > { %s1305_s19 = sand.u32 1, %s1924_s26   ;;  %p2391_p12 = scmp.ge.s32.totalorder %s1936_s29, 2 }
 0x374   : > { %s1306_s15 = scalar_lea.sflag [#allocation5], %s1305_s19 }
 0x375   : > { %p1738_p13 = pnand %p2391_p12, %p2023_p6 }
 0x377   : > { %p1739_p0 = pneg %p1738_p13 }
 0x379   : > { %1919 = dma.done.wait (%p1739_p0), %s1306_s15, 2048  }
 0x37a   : > { %1921 = vsyncadd (%p1739_p0), %s1306_s15, 4294965248  ;;  %p22_p3 = scmp.ge.s32.totalorder %s2041_s16, 4   ;;  %s2392_s26 = smov %s1928_s27 }
 0x37b   : > { %s2393_s27 = smov %s1932_s28  ;;  %s2394_s28 = smov %s2051_s21 }
 0x37c   : > { %s2395_s29 = smov %s2041_s16  ;;  %24 = sbr.rel (!%p22_p3) target bundleno = 8 (0x8), region = 97 }
 0x381   :  { %1312 = vsyncpa [#allocation4], 1 }
 0x382   :  { %1314 = vsyncpa [#allocation4 + $0x1], 1 }
 0x383   :  { %1315 = vsyncpa [#allocation7], 1 }
 0x384   :  { %1316 = vsyncpa [#allocation5], 1 }
 0x385   :  { %1318 = vsyncpa [#allocation5 + $0x1], 1 }

// kernel: tpu_custom_call.1
= control target key start
LH: loop header
LB: loop body
LE: loop exit
PB: predicated region body
PF: predicated region fallthrough
CT: control target
= control target key end

     0   :  { %s2378_s0 = inlined_call_operand.hbm [shape: f32[4,32,256], index: 0, kind: input, shape index: {}]   ;;  %s2379_s1 = inlined_call_operand.vmem [shape: f32[32,8], index: 1, kind: input, shape index: {}]   ;;  %s2380_s2 = inlined_call_operand.vmem [shape: f32[1,8], index: 2, kind: input, shape index: {}]   ;;  %s2381_s3 = inlined_call_operand.vmem [shape: f32[8,32], index: 3, kind: input, shape index: {}]   ;;  %s2382_s4 = inlined_call_operand.vmem [shape: f32[1,32], index: 4, kind: input, shape index: {}]   ;;  %s2383_s5 = inlined_call_operand.hbm [shape: bf16[512,256], index: 5, kind: input, shape index: {}]   ;;  %s2384_s6 = inlined_call_operand.<no memory space> [shape: f32[1], index: 6, kind: input, shape index: {}]   ;;  %s2385_s7 = inlined_call_operand.hbm [shape: f32[4,32,256], index: 7, kind: output, shape index: {}]  }
   0x1   :  { %12 = sst [smem:[#allocation2]] %s2384_s6 }
   0x2   :  { %13 = vsyncpa [#allocation4], 0 }
   0x3   :  { %15 = vsyncpa [#allocation4 + $0x1], 0 }
   0x4   :  { %16 = vsyncpa [#allocation7], 0 }
   0x5   :  { %17 = vsyncpa [#allocation5], 0 }
   0x6   :  { %19 = vsyncpa [#allocation5 + $0x1], 0  ;;  %s1988_s26 = smov 0   ;;  %s1990_s27 = smov 0  }
   0x7   :  { %s1992_s28 = smov 0   ;;  %s1994_s29 = smov 0  }
   0x8 LB: > { %s2009_s6 = sadd.s32 4294967295, %s1936_s29   ;;  %s1374_s30 = sadd.s32 4294967294, %s1936_s29   ;;  %s1936_s29 = sphi %s1994_s29, %s2395_s29   ;;  %s1932_s28 = sphi %s1992_s28, %s2394_s28   ;;  %s1928_s27 = sphi %s1990_s27, %s2393_s27   ;;  %s1924_s26 = sphi %s1988_s26, %s2392_s26  }
   0x9   : > { %p45_p0 = scmp.ne.s32.totalorder %s1928_s27, %s1924_s26  ;;  %p46_p1 = scmp.eq.s32.totalorder %s2009_s6, 0 }
   0xa   : > { %p195_p2 = scmp.eq.s32.totalorder %s2009_s6, 1  ;;  %p201_p3 = scmp.eq.s32.totalorder %s1374_s30, 1 }
   0xb   : > { %p2018_p4 = por %p46_p1, %p45_p0  ;;  %p1375_p5 = scmp.ge.s32.totalorder %s1936_s29, 1 }
   0xc   : > { %p2023_p6 = por %p201_p3, %p45_p0  ;;  %p208_p7 = scmp.lt.s32.totalorder %s1936_s29, 3 }
   0xd   : > { %s231_s12 = sshll.u32 %s2383_s5, 4  ;;  %s1938_s14 = smov [#allocation6]   ;;  %s232_s12 = int_to_ptr.hbm [resolvable:$true] %s231_s12 }
   0xe   : > { %p2031_p8 = pnand %p1375_p5, %p208_p7  ;;  %s233_s15 = sshll.u32 %s1938_s14, 4  ;;  %s234_s15 = int_to_ptr.vmem [resolvable:$true] %s233_s15 }
   0xf   : > { %s2041_s16 = sadd.s32 1, %s1936_s29   ;;  %s1939_s17 = smov 128  }
  0x10   : > { %p1729_p9 = pneg %p2031_p8  ;;  %s1940_s18 = smov 8  }
  0x11   : > { %s29_s19 = ssub.s32 %s1936_s29, %s2041_s16  ;;  %s32_s20 = sadd.s32 1, %s1932_s28 }
  0x12   : > { %p1730_p10 = pnand %p1729_p9, %p46_p1  ;;  %p30_p12 = scmp.eq.s32.totalorder %s29_s19, 0 }
  0x13   : > { %p39_p13 = scmp.ne.s32.totalorder %s1932_s28, %s1928_s27  ;;  %p40_p0 = scmp.eq.s32.totalorder %s1936_s29, 0 }
  0x14   : > { %1732 = dma.hbm_to_vmem [thread:$0]  (!%p1730_p10), %s232_s12, 8192, %s234_s15, [#allocation7], %s1939_s17, %s1939_s17, %s1940_s18  }
  0x15   : > { %p1742_p3 = scmp.lt.s32.totalorder %s1936_s29, 2  ;;  %p41_p5 = por %p40_p0, %p39_p13 }
  0x16   : > { %s2051_s21 = scalar_select %p30_p12, %s1932_s28, %s32_s20  }
  0x17   : > { %p2055_p7 = por %p195_p2, %p39_p13  ;;  %s250_s23 = sand.u32 1, %s1932_s28  }
  0x18   : > { %s1654_s24 = sshll.u32 %s1936_s29, 7  ;;  %s1378_s25 = sshll.u32 %s250_s23, 7 }
  0x19   : > { %s260_s11 = scalar_lea.hbm %s2378_s0, %s1654_s24  ;;  %s254_s14 = scalar_lea.vmem [#allocation3], %s1378_s25 }
  0x1a   : > { %s261_s12 = sshll.u32 %s260_s11, 4  ;;  %s263_s15 = sshll.u32 %s254_s14, 4  ;;  %s262_s12 = int_to_ptr.hbm [resolvable:$true] %s261_s12  ;;  %s264_s15 = int_to_ptr.vmem [resolvable:$true] %s263_s15 }
  0x1b   : > { %p2066_p9 = pnand %p1742_p3, %p41_p5  ;;  %s251_s18 = scalar_lea.sflag [#allocation4], %s250_s23 }
  0x1c   : > { %s1836_s19 = sshra.s32 %s262_s12, 4  ;;  %s1843_s30 = scalar_lea.hbm %s2378_s0, 256  ;;  %s1837_s19 = int_to_ptr.hbm [resolvable:$true] %s1836_s19 }
  0x1d   : > { %s1838_s20 = scalar_lea.hbm %s1837_s19, 128  ;;  %p1840_p10 = pneg %p2066_p9 }
  0x1e   : > { %p1839_p2 = scmp.ne.s32.totalorder %s1837_s19, %s1838_s20  ;;  %p1844_p0 = scmp.lt.s32.totalorder %s1837_s19, %s2378_s0 }
  0x1f   : > { %p1845_p3 = scmp.lt.s32.totalorder %s1843_s30, %s1838_s20 }
  0x20   : > { %p1841_p12 = pnand %p1840_p10, %p1839_p2 }
  0x21   : > { %p1846_p5 = por %p1845_p3, %p1844_p0 }
  0x22   : > { %p1842_p13 = pneg %p1841_p12 }
  0x24   : > { %p1847_p11 = pnand %p1846_p5, %p1842_p13 }
  0x26   : > { %1850 = shalt.err (!%p1847_p11)
}
  0x27   : > { %s1941_s23 = smov 256   ;;  %s1942_s14 = smov 16  }
  0x28   : > { %1736 = dma.hbm_to_vmem [thread:$0]  (!%p2066_p9), %s262_s12, 2048, %s264_s15, %s251_s18, %s1941_s23, %s1941_s23, %s1942_s14  }
  0x29   : > { %275 = sbr.rel (%p2031_p8) target bundleno = 883 (0x373), region = 48  ;;  %s2083_s24 = sand.u32 (!%p2031_p8), 1, %s1928_s27  }
  0x2a   : > { %s1383_s19 = sshll.u32 (!%p2031_p8), %s2083_s24, 7  ;;  %s278_s20 = scalar_lea.sflag (!%p2031_p8), [#allocation4], %s2083_s24 }
  0x2b   : > { %s2089_s25 = scalar_lea.vmem (!%p2031_p8), [#allocation3], %s1383_s19 }
  0x2e   : > { %1911 = dma.done.wait (%p2018_p4), %s278_s20, 2048  }
  0x2f   : > { %1913 = vsyncadd (%p2018_p4), %s278_s20, 4294965248 }
  0x30   : > { %1915 = dma.done.wait (%p46_p1), [#allocation7], 8192  }
  0x31   : > { %1917 = vsyncadd (%p46_p1), [#allocation7], 4294959104  ;;  %v2100_v0 = vld [vmem:[%s2089_s25 + $0x40] sm:$0xff]  ;;  %v2103_v1 = vld [vmem:[%s2089_s25 + $0x48] sm:$0xff]  ;;  %v400_v45 = vlaneseq  ;;  %vm405_vm0 = vcmask 130112   ;;  %vm409_vm1 = vcmask 195712  }
  0x32   : > { %v2106_v2 = vld [vmem:[%s2089_s25] sm:$0xff]  ;;  %v348_v3 = vadd.f32 %v2103_v1, %v2100_v0  ;;  %v2111_v4 = vld [vmem:[%s2089_s25 + $0x8] sm:$0xff]  ;;  %v2124_v9 = vld [vmem:[%s2089_s25 + $0x50] sm:$0xff]  ;;  %v380_v25 = vmax.f32 %v2100_v0, %v2103_v1  ;;  %vm413_vm2 = vcmask 261312   ;;  %vm422_vm3 = vcmask 1041409   ;;  %s763_s13 = sld [smem:[#allocation2]] }
  0x33   : > { %v2114_v5 = vld [vmem:[%s2089_s25 + $0x20] sm:$0xff]  ;;  %v2117_v6 = vld [vmem:[%s2089_s25 + $0x28] sm:$0xff]  ;;  %v336_v7 = vadd.f32 %v2111_v4, %v2106_v2  ;;  %v2127_v10 = vld [vmem:[%s2089_s25 + $0x58] sm:$0xff]  ;;  %v368_v24 = vmax.f32 %v2106_v2, %v2111_v4  ;;  %v401_v49 = vand.u32 127, %v400_v45  ;;  %vm447_vm4 = vcmask 1043459   ;;  %s2315_s12 = scalar_lea.vmem [#allocation8], %s1383_s19 }
  0x34   : > { %v342_v8 = vadd.f32 %v2117_v6, %v2114_v5  ;;  %349 = vadd.xlane.f32.xlu1 %v348_v3  ;;  %v2130_v11 = vld [vmem:[%s2089_s25 + $0x10] sm:$0xff]  ;;  %v2133_v12 = vld [vmem:[%s2089_s25 + $0x18] sm:$0xff]  ;;  %v2136_v13 = vld [vmem:[%s2089_s25 + $0x60] sm:$0xff]  ;;  %v351_v15 = vadd.f32 %v2127_v10, %v2124_v9  ;;  %v383_v27 = vmax.f32 %v2124_v9, %v2127_v10  ;;  %v374_v29 = vmax.f32 %v2114_v5, %v2117_v6  ;;  %s1720_s19 = sshll.u32 %s2009_s6, 7  ;;  %s1288_s6 = sshll.u32 %s2315_s12, 4  ;;  %s1289_s6 = int_to_ptr.vmem [resolvable:$true] %s1288_s6 }
  0x35   : > { %337 = vadd.xlane.f32.xlu0 %v336_v7  ;;  %v2139_v14 = vld [vmem:[%s2089_s25 + $0x68] sm:$0xff]  ;;  %v339_v16 = vadd.f32 %v2133_v12, %v2130_v11  ;;  %v2148_v18 = vld [vmem:[%s2089_s25 + $0x70] sm:$0xff]  ;;  %v2151_v19 = vld [vmem:[%s2089_s25 + $0x78] sm:$0xff]  ;;  %v371_v26 = vmax.f32 %v2130_v11, %v2133_v12  ;;  %v403_v51 = vadd.s32 4294967288, %v401_v49  ;;  %v407_v55 = vadd.s32 4294967280, %v401_v49  ;;  %s1287_s18 = scalar_lea.hbm %s2385_s7, %s1720_s19  ;;  %s1275_s10 = scalar_lea.sflag [#allocation5], %s2083_s24 }
  0x36   : > { %343 = vadd.xlane.f32.xlu2 %v342_v8  ;;  %v354_v17 = vadd.f32 %v2139_v14, %v2136_v13  ;;  %v2154_v20 = vld [vmem:[%s2089_s25 + $0x30] sm:$0xff]  ;;  %v2157_v21 = vld [vmem:[%s2089_s25 + $0x38] sm:$0xff]  ;;  %v357_v22 = vadd.f32 %v2151_v19, %v2148_v18  ;;  %v386_v28 = vmax.f32 %v2136_v13, %v2139_v14  ;;  %v389_v31 = vmax.f32 %v2148_v18, %v2151_v19  ;;  %v453_v40 = vld [vmem:[%s2379_s1 + $0x8] sm:$0xff]  ;;  %s1290_s30 = sshll.u32 %s1287_s18, 4  ;;  %s1886_s25 = scalar_lea.hbm %s2385_s7, 256  ;;  %s1291_s30 = int_to_ptr.hbm [resolvable:$true] %s1290_s30 }
  0x37   : > { %v345_v23 = vadd.f32 %v2157_v21, %v2154_v20  ;;  %v377_v30 = vmax.f32 %v2154_v20, %v2157_v21  ;;  %v455_v35 = vld [vmem:[%s2379_s1 + $0x18] sm:$0xff]  ;;  %v454_v39 = vld [vmem:[%s2379_s1 + $0x10] sm:$0xff]  ;;  %v452_v41 = vld [vmem:[%s2379_s1] sm:$0xff]  ;;  %v411_v59 = vadd.s32 4294967272, %v401_v49  ;;  %vm450_vm5 = vcmask 1041408   ;;  %s1880_s11 = sshra.s32 %s1291_s30, 4  ;;  %s1881_s11 = int_to_ptr.hbm [resolvable:$true] %s1880_s11 }
  0x38   : > { %476 = vmatpush.msra.mxu0 %v455_v35  ;;  %vm460_vm6 = vcmask 261120   ;;  %vm490_vm7 = vcmask 64512   ;;  %s1882_s23 = scalar_lea.hbm %s1881_s11, 128  ;;  %p1887_p11 = scmp.lt.s32.totalorder %s1881_s11, %s2385_s7 }
  0x39   : > { %p1883_p1 = scmp.ne.s32.totalorder %s1881_s11, %s1882_s23  ;;  %p1888_p9 = scmp.lt.s32.totalorder %s1886_s25, %s1882_s23 }
  0x3a   : > { %477 = vmatpush.msra.mxu0 %v454_v39 }
  0x3b   : > { %p1884_p4 = pnand %p1883_p1, %p2055_p7  ;;  %p1889_p2 = por %p1888_p9, %p1887_p11 }
  0x3c   : > { %352 = vadd.xlane.f32.xlu1 %v351_v15  ;;  %478 = vmatpush.msra.mxu0 %v453_v40 }
  0x3d   : > { %340 = vadd.xlane.f32.xlu0 %v339_v16  ;;  %p1885_p8 = pneg %p1884_p4 }
  0x3e   : > { %355 = vadd.xlane.f32.xlu2 %v354_v17  ;;  %479 = vmatpush.msra.mxu0 %v452_v41 }
  0x3f   : > { %p1890_p10 = pnand %p1889_p2, %p1885_p8 }
  0x44   : > { %358 = vadd.xlane.f32.xlu1 %v357_v22 }
  0x45   : > { %346 = vadd.xlane.f32.xlu0 %v345_v23 }
  0x46   : > { %369 = vmax.xlane.f32.xlu2 %v368_v24 }
  0x4c   : > { %381 = vmax.xlane.f32.xlu1 %v380_v25 }
  0x4d   : > { %372 = vmax.xlane.f32.xlu0 %v371_v26 }
  0x4e   : > { %384 = vmax.xlane.f32.xlu2 %v383_v27 }
  0x54   : > { %387 = vmax.xlane.f32.xlu1 %v386_v28 }
  0x55   : > { %375 = vmax.xlane.f32.xlu0 %v374_v29 }
  0x56   : > { %378 = vmax.xlane.f32.xlu2 %v377_v30 }
  0x5d   : > { %390 = vmax.xlane.f32.xlu0 %v389_v31 }
  0xa7   : > { %v350_v32 = vpop.xlane.xlu1 %349 }
  0xa8   : > { %v338_v33 = vpop.xlane.xlu0 %337  ;;  %v364_v50 = vmul.f32 0.00390625, %v350_v32 }
  0xa9   : > { %v344_v34 = vpop.xlane.xlu2 %343  ;;  %v360_v54 = vmul.f32 0.00390625, %v338_v33 }
  0xaa   : > { %v415_v56 = vperm.slane %v364_v50, %v401_v49  ;;  %v362_v57 = vmul.f32 0.00390625, %v344_v34  ;;  %v1792_v50 = vld [vmem:[%s2380_s2] ss:$0 sm:$0xff] }
  0xab   : > { %v402_v7 = vperm.slane %v360_v54, %v401_v49  ;;  %v539_v54 = vshrl.u32 %v400_v45, 7 }
  0xac   : > { %v408_v23 = vperm.slane %v362_v57, %v407_v55 }
  0xad   : > { %1786 = vset.pattern.permute.xlu0 %v539_v54  ;;  %1784 = vset.pattern.permute.xlu1 %v539_v54 }
  0xaf   : > { %v353_v36 = vpop.xlane.xlu1 %352 }
  0xb0   : > { %v341_v37 = vpop.xlane.xlu0 %340  ;;  %v365_v52 = vmul.f32 0.00390625, %v353_v36 }
  0xb1   : > { %v356_v38 = vpop.xlane.xlu2 %355  ;;  %v361_v53 = vmul.f32 0.00390625, %v341_v37 }
  0xb2   : > { %v366_v58 = vmul.f32 0.00390625, %v356_v38  ;;  %v416_v61 = vperm.slane %v365_v52, %v403_v51 }
  0xb3   : > { %v404_v62 = vperm.slane %v361_v53, %v403_v51 }
  0xb4   : > { %v418_v24 = vperm.slane %v366_v58, %v407_v55  ;;  %v417_v27 = vsel %vm405_vm0, %v416_v61, %v415_v56  ;;  %v1793_v56 = vld [vmem:[%s2382_s4] ss:$0 sm:$0xff] }
  0xb5   : > { %v406_v28 = vsel %vm405_vm0, %v404_v62, %v402_v7 }
  0xb6   : > { %v419_v35 = vsel %vm409_vm1, %v418_v24, %v417_v27  ;;  %v410_v38 = vsel %vm409_vm1, %v408_v23, %v406_v28  ;;  %v552_v27 = vadd.s32 16, %v539_v54  ;;  %v558_v28 = vadd.s32 24, %v539_v54 }
  0xb7   : > { %v359_v42 = vpop.xlane.xlu1 %358 }
  0xb8   : > { %v347_v43 = vpop.xlane.xlu0 %346  ;;  %v367_v63 = vmul.f32 0.00390625, %v359_v42 }
  0xb9   : > { %v370_v44 = vpop.xlane.xlu2 %369  ;;  %v363_v3 = vmul.f32 0.00390625, %v347_v43 }
  0xba   : > { %v433_v8 = vperm.slane %v370_v44, %v401_v49  ;;  %v420_v29 = vperm.slane %v367_v63, %v411_v59 }
  0xbb   : > { %v412_v30 = vperm.slane %v363_v3, %v411_v59 }
  0xbc   : > { %v421_v41 = vsel %vm413_vm2, %v420_v29, %v419_v35  ;;  %v1447_v29 = vld [vmem:[#allocation6 + $0x70] sm:$0xf]  ;;  %v1702_v35 = vld [vmem:[#allocation6 + $0x174] sm:$0xf0] }
  0xbd   : > { %v414_v40 = vsel %vm413_vm2, %v412_v30, %v410_v38  ;;  %v1670_v30 = vld [vmem:[#allocation6 + $0x74] sm:$0xf0]  ;;  %v1639_v38 = vld [vmem:[#allocation6 + $0x1f0] sm:$0xf] }
  0xbf   : > { %v382_v47 = vpop.xlane.xlu1 %381 }
  0xc0   : > { %v373_v46 = vpop.xlane.xlu0 %372  ;;  %v440_v15 = vperm.slane %v382_v47, %v401_v49  ;;  %v485_v49 = vld [vmem:[%s2381_s3] sm:$0xff] }
  0xc1   : > { %v385_v48 = vpop.xlane.xlu2 %384  ;;  %v434_v16 = vperm.slane %v373_v46, %v403_v51  ;;  %v423_v46 = vsel %vm422_vm3, %v421_v41, %v414_v40  ;;  %509 = vmatpush.msra.mxu1 %v485_v49  ;;  %v1439_v40 = vld [vmem:[#allocation6 + $0x60] sm:$0xf] }
  0xc2   : > { %v441_v17 = vperm.slane %v385_v48, %v403_v51  ;;  %v1631_v49 = vld [vmem:[#allocation6 + $0x1e0] sm:$0xf] }
  0xc3   : > { %v435_v32 = vsel %vm405_vm0, %v434_v16, %v433_v8 }
  0xc4   : > { %v442_v33 = vsel %vm405_vm0, %v441_v17, %v440_v15 }
  0xc7   : > { %v388_v22 = vpop.xlane.xlu1 %387 }
  0xc8   : > { %v376_v60 = vpop.xlane.xlu0 %375  ;;  %v443_v31 = vperm.slane %v388_v22, %v407_v55 }
  0xc9   : > { %v436_v25 = vperm.slane %v376_v60, %v407_v55  ;;  %v379_v26 = vpop.xlane.xlu2 %378  ;;  %v546_v55 = vadd.s32 8, %v539_v54  ;;  %v1666_v54 = vld [vmem:[#allocation6 + $0x54] sm:$0xf0] }
  0xca   : > { %v438_v34 = vperm.slane %v379_v26, %v411_v59  ;;  %v444_v42 = vsel %vm409_vm1, %v443_v31, %v442_v33  ;;  %v1511_v31 = vld [vmem:[#allocation6 + $0xf0] sm:$0xf]  ;;  %v1686_v33 = vld [vmem:[#allocation6 + $0xf4] sm:$0xf0] }
  0xcb   : > { %v437_v36 = vsel %vm409_vm1, %v436_v25, %v435_v32  ;;  %1785 = vset.pattern.permute.xlu2 %v546_v55  ;;  %v1448_v32 = vor.u32 %v1670_v30, %v1447_v29  ;;  %v1415_v30 = vld [vmem:[#allocation6 + $0x30] sm:$0xf] }
  0xcc   : > { %v439_v43 = vsel %vm413_vm2, %v438_v34, %v437_v36  ;;  %v1575_v34 = vld [vmem:[#allocation6 + $0x170] sm:$0xf]  ;;  %v1512_v36 = vor.u32 %v1686_v33, %v1511_v31  ;;  %v1662_v31 = vld [vmem:[#allocation6 + $0x34] sm:$0xf0] }
  0xcd   : > { %1085 = vmatpush.bf16.msra.mxu2 %v1448_v32  ;;  %v1479_v32 = vld [vmem:[#allocation6 + $0xb0] sm:$0xf]  ;;  %v1416_v33 = vor.u32 %v1662_v31, %v1415_v30  ;;  %v1688_v30 = vld [vmem:[#allocation6 + $0x104] sm:$0xf0]  ;;  %v1583_v31 = vld [vmem:[#allocation6 + $0x180] sm:$0xf] }
  0xce   : > { %1098 = vmatpush.bf16.msra.mxu3 %v1512_v36  ;;  %v1543_v36 = vld [vmem:[#allocation6 + $0x130] sm:$0xf] }
  0xd0   : > { %v391_v37 = vpop.xlane.xlu0 %390 }
  0xd1   : > { %v445_v39 = vperm.slane %v391_v37, %v411_v59  ;;  %v1576_v37 = vor.u32 %v1702_v35, %v1575_v34  ;;  %v1678_v34 = vld [vmem:[#allocation6 + $0xb4] sm:$0xf0] }
  0xd2   : > { %v1480_v35 = vor.u32 %v1678_v34, %v1479_v32  ;;  %v1704_v32 = vld [vmem:[#allocation6 + $0x184] sm:$0xf0] }
  0xd3   : > { %v446_v44 = vsel %vm413_vm2, %v445_v39, %v444_v42  ;;  %v1718_v39 = vld [vmem:[#allocation6 + $0x1f4] sm:$0xf0]  ;;  %v1668_v42 = vld [vmem:[#allocation6 + $0x64] sm:$0xf0]  ;;  %1111 = vmatpush.bf16.msrb.mxu1 %v1576_v37 }
  0xd4   : > { %v448_v47 = vsel %vm447_vm4, %v446_v44, %v439_v43  ;;  %v1640_v41 = vor.u32 %v1718_v39, %v1639_v38  ;;  %v1503_v43 = vld [vmem:[#allocation6 + $0xe0] sm:$0xf]  ;;  %v1684_v44 = vld [vmem:[#allocation6 + $0xe4] sm:$0xf0]  ;;  %v1694_v37 = vld [vmem:[#allocation6 + $0x134] sm:$0xf0] }
  0xd5   : > { %v451_v48 = vsel %vm450_vm5, %v423_v46, %v448_v47  ;;  %v1440_v46 = vor.u32 %v1668_v42, %v1439_v40  ;;  %v1567_v47 = vld [vmem:[#allocation6 + $0x160] sm:$0xf]  ;;  %v1607_v38 = vld [vmem:[#allocation6 + $0x1b0] sm:$0xf]  ;;  %v1544_v39 = vor.u32 %v1694_v37, %v1543_v36  ;;  %v1710_v40 = vld [vmem:[#allocation6 + $0x1b4] sm:$0xf0] }
  0xd6   : > { %1386 = vmatmul.msk.f32.vlgmr.msra.gmra.mxu0 %vm460_vm6, %v451_v48  ;;  %v1700_v48 = vld [vmem:[#allocation6 + $0x164] sm:$0xf0]  ;;  %v1407_v42 = vld [vmem:[#allocation6 + $0x20] sm:$0xf]  ;;  %v1701_v37 = vld [vmem:[#allocation6 + $0x174] sm:$0xf] }
  0xd7   : > { %1124 = vmatpush.bf16.msrb.mxu0 %v1640_v41  ;;  %1086 = vmatpush.bf16.msra.mxu2 %v1440_v46  ;;  %v1608_v41 = vor.u32 %v1710_v40, %v1607_v38  ;;  %v1577_v38 = vld [vmem:[#allocation6 + $0x178] sm:$0xf0]  ;;  %vm1230_vm4 = vcmask 1040384  }
 0x153   : > { %v481_v51 = vpop.f32.mrf.mxu0 }
 0x154   : > { %v482_v52 = vadd.f32 %v1792_v50, %v481_v51  ;;  %v1504_v50 = vor.u32 %v1684_v44, %v1503_v43  ;;  %v1568_v51 = vor.u32 %v1700_v48, %v1567_v47  ;;  %v1660_v43 = vld [vmem:[#allocation6 + $0x24] sm:$0xf0]  ;;  %v1471_v44 = vld [vmem:[#allocation6 + $0xa0] sm:$0xf] }
 0x155   : > { %v1408_v46 = vor.u32 %v1660_v43, %v1407_v42  ;;  %v1676_v47 = vld [vmem:[#allocation6 + $0xa4] sm:$0xf0]  ;;  %v1580_v42 = vor.u32 %v1701_v37, %v1577_v38  ;;  %v1641_v43 = vld [vmem:[#allocation6 + $0x1f8] sm:$0xf0] }
 0x156   : > { %v484_v53 = vmax.f32 %v482_v52, 0.0  ;;  %v1716_v52 = vld [vmem:[#allocation6 + $0x1e4] sm:$0xf0]  ;;  %1099 = vmatpush.bf16.msra.mxu3 %v1504_v50  ;;  %1112 = vmatpush.bf16.msrb.mxu1 %v1568_v51  ;;  %v1472_v48 = vor.u32 %v1676_v47, %v1471_v44  ;;  %v1599_v51 = vld [vmem:[#allocation6 + $0x1a0] sm:$0xf] }
 0x157   : > { %v1632_v55 = vor.u32 %v1716_v52, %v1631_v49  ;;  %v1535_v49 = vld [vmem:[#allocation6 + $0x120] sm:$0xf]  ;;  %v1692_v50 = vld [vmem:[#allocation6 + $0x124] sm:$0xf0]  ;;  %v1667_v44 = vld [vmem:[#allocation6 + $0x64] sm:$0xf] }
 0x158   : > { %1387 = vmatmul.msk.f32.vlgmr.msra.gmra.mxu1 %vm490_vm7, %v484_v53  ;;  %v1431_v53 = vld [vmem:[#allocation6 + $0x50] sm:$0xf]  ;;  %v1536_v52 = vor.u32 %v1692_v50, %v1535_v49  ;;  %v1683_v50 = vld [vmem:[#allocation6 + $0xe4] sm:$0xf] }
 0x159   : > { %1125 = vmatpush.bf16.msrb.mxu0 %v1632_v55  ;;  %v1658_v55 = vld [vmem:[#allocation6 + $0x14] sm:$0xf0] }
 0x1d5   : > { %v511_v57 = vpop.f32.mrf.mxu1 }
 0x1d6   : > { %v512_v58 = vadd.f32 %v1793_v56, %v511_v57  ;;  %v1495_v56 = vld [vmem:[#allocation6 + $0xd0] sm:$0xf]  ;;  %v1682_v57 = vld [vmem:[#allocation6 + $0xd4] sm:$0xf0] }
 0x1d8   : > { %v515_v59 = vrot.slane %v512_v58, 2 }
 0x1da   : > { %v517_v60 = vadd.f32 %v515_v59, %v512_v58  ;;  %v1432_v58 = vor.u32 %v1666_v54, %v1431_v53  ;;  %v1496_v59 = vor.u32 %v1682_v57, %v1495_v56  ;;  %v1708_v53 = vld [vmem:[#allocation6 + $0x1a4] sm:$0xf0]  ;;  %v1399_v54 = vld [vmem:[#allocation6 + $0x10] sm:$0xf] }
 0x1db   : > { %v1600_v56 = vor.u32 %v1708_v53, %v1599_v51  ;;  %v1400_v57 = vor.u32 %v1658_v55, %v1399_v54  ;;  %v1505_v51 = vld [vmem:[#allocation6 + $0xe8] sm:$0xf0]  ;;  %v1699_v54 = vld [vmem:[#allocation6 + $0x164] sm:$0xf] }
 0x1dc   : > { %v1388_v61 = vmul.f32 -1.442695, %v517_v60  ;;  %1087 = vmatpush.bf16.msra.mxu2 %v1432_v58  ;;  %v1559_v60 = vld [vmem:[#allocation6 + $0x150] sm:$0xf]  ;;  %1100 = vmatpush.bf16.msra.mxu3 %v1496_v59  ;;  %v1674_v59 = vld [vmem:[#allocation6 + $0x94] sm:$0xf0]  ;;  %v1508_v53 = vor.u32 %v1683_v50, %v1505_v51 }
 0x1dd   : > { %v1463_v58 = vld [vmem:[#allocation6 + $0x90] sm:$0xf]  ;;  %v1569_v55 = vld [vmem:[#allocation6 + $0x168] sm:$0xf0]  ;;  %v1481_v50 = vld [vmem:[#allocation6 + $0xb8] sm:$0xf0] }
 0x1de   : > { %1794 = vpow2.f32 %v1388_v61  ;;  %v1698_v61 = vld [vmem:[#allocation6 + $0x154] sm:$0xf0] }
 0x1e4   : > { %v1795_v62 = vpop.eup %1794 }
 0x1e5   : > { %v521_v63 = vadd.f32 1.0, %v1795_v62  ;;  %v1623_v62 = vld [vmem:[#allocation6 + $0x1d0] sm:$0xf] }
 0x1e7   : > { %1796 = vrcp.f32 %v521_v63  ;;  %v533_v8 = vand.u32 2147483648, %v521_v63  ;;  %v531_v16 = vand.u32 2147483647, %v521_v63  ;;  %vm527_vm9 = vweird.f32 %v521_v63 }
 0x1e9   : > { %v534_v22 = vor.u32 1.1754944e-38, %v533_v8  ;;  %vm532_vm11 = vcmp.eq.f32.partialorder %v531_v16, 8.507059e+37  ;;  %v1664_v8 = vld [vmem:[#allocation6 + $0x44] sm:$0xf0] }
 0x1ed   : > { %v1797_v3 = vpop.eup %1796 }
 0x1ee   : > { %v523_v7 = vmul.f32 %v1797_v3, %v521_v63  ;;  %vm528_vm8 = vweird.f32 %v1797_v3  ;;  %v1560_v63 = vor.u32 %v1698_v61, %v1559_v60  ;;  %v1464_v60 = vor.u32 %v1674_v59, %v1463_v58 }
 0x1ef   : > { %vm529_vm10 = vmor %vm527_vm9, %vm528_vm8  ;;  %v1572_v59 = vor.u32 %v1699_v54, %v1569_v55  ;;  %v1693_v54 = vld [vmem:[#allocation6 + $0x134] sm:$0xf] }
 0x1f0   : > { %v524_v45 = vsub.f32 1.0, %v523_v7  ;;  %1113 = vmatpush.bf16.msrb.mxu1 %v1560_v63  ;;  %v1690_v63 = vld [vmem:[#allocation6 + $0x114] sm:$0xf0] }
 0x1f2   : > { %v525_v15 = vmul.f32 %v1797_v3, %v524_v45  ;;  %v1423_v45 = vld [vmem:[#allocation6 + $0x40] sm:$0xf] }
 0x1f3   : > { %v1424_v16 = vor.u32 %v1664_v8, %v1423_v45 }
 0x1f4   : > { %v526_v17 = vadd.f32 %v1797_v3, %v525_v15  ;;  %v1487_v15 = vld [vmem:[#allocation6 + $0xc0] sm:$0xf] }
 0x1f5   : > { %1088 = vmatpush.bf16.msra.mxu2 %v1424_v16  ;;  %v1656_v16 = vld [vmem:[#allocation6 + $0x4] sm:$0xf0] }
 0x1f6   : > { %v530_v23 = vsel %vm529_vm10, %v1797_v3, %v526_v17  ;;  %v1714_v3 = vld [vmem:[#allocation6 + $0x1d4] sm:$0xf0]  ;;  %v1680_v17 = vld [vmem:[#allocation6 + $0xc4] sm:$0xf0] }
 0x1f7   : > { %v535_v24 = vsel %vm532_vm11, %v534_v22, %v530_v23  ;;  %v1624_v7 = vor.u32 %v1714_v3, %v1623_v62  ;;  %v1488_v22 = vor.u32 %v1680_v17, %v1487_v15  ;;  %v1551_v23 = vld [vmem:[#allocation6 + $0x140] sm:$0xf]  ;;  %v1527_v62 = vld [vmem:[#allocation6 + $0x110] sm:$0xf] }
 0x1f8   : > { %v562_v25 = vperm.slane %v535_v24, 1  ;;  %v537_v26 = vperm.slane %v535_v24, 0  ;;  %v1696_v24 = vld [vmem:[#allocation6 + $0x144] sm:$0xf0]  ;;  %v1591_v3 = vld [vmem:[#allocation6 + $0x190] sm:$0xf]  ;;  %v1528_v45 = vor.u32 %v1690_v63, %v1527_v62 }
 0x1f9   : > { %1126 = vmatpush.bf16.msrb.mxu0 %v1624_v7  ;;  %1101 = vmatpush.bf16.msra.mxu3 %v1488_v22  ;;  %v1706_v7 = vld [vmem:[#allocation6 + $0x194] sm:$0xf0]  ;;  %v1391_v15 = vld [vmem:[#allocation6] sm:$0xf]  ;;  %v1672_v22 = vld [vmem:[#allocation6 + $0x84] sm:$0xf0] }
 0x1fa   : > { %567 = vperm.xlu0 %1786, %v562_v25   ;;  %548 = vperm.xlu2 %1785, %v537_v26   ;;  %v1592_v8 = vor.u32 %v1706_v7, %v1591_v3  ;;  %v1455_v17 = vld [vmem:[#allocation6 + $0x80] sm:$0xf]  ;;  %v1665_v62 = vld [vmem:[#allocation6 + $0x54] sm:$0xf]  ;;  %v1433_v63 = vld [vmem:[#allocation6 + $0x58] sm:$0xf0] }
 0x1fb   : > { %542 = vperm.xlu1 %1784, %v537_v26   ;;  %1089 = vmatpush.bf16.msra.mxu2 %v1416_v33  ;;  %v1392_v33 = vor.u32 %v1656_v16, %v1391_v15  ;;  %v1456_v34 = vor.u32 %v1672_v22, %v1455_v17  ;;  %v1681_v3 = vld [vmem:[#allocation6 + $0xd4] sm:$0xf]  ;;  %v1561_v16 = vld [vmem:[#allocation6 + $0x158] sm:$0xf0] }
 0x1fc   : > { %v1697_v15 = vld [vmem:[#allocation6 + $0x154] sm:$0xf] }
 0x1fd   : > { %1102 = vmatpush.bf16.msra.mxu3 %v1480_v35  ;;  %v1713_v17 = vld [vmem:[#allocation6 + $0x1d4] sm:$0xf] }
 0x1ff   : > { %1090 = vmatpush.bf16.msra.mxu2 %v1408_v46  ;;  %v1441_v46 = vld [vmem:[#allocation6 + $0x68] sm:$0xf0] }
 0x201   : > { %1103 = vmatpush.bf16.msra.mxu3 %v1472_v48 }
 0x202   : > { %573 = vperm.xlu2 %1785, %v562_v25   ;;  %1791 = vset.pattern.permute.xlu0 %v558_v28 }
 0x203   : > { %1787 = vset.pattern.permute.xlu1 %v552_v27  ;;  %1091 = vmatpush.bf16.msra.mxu2 %v1400_v57 }
 0x205   : > { %1104 = vmatpush.bf16.msra.mxu3 %v1464_v60 }
 0x207   : > { %1092 = vmatpush.bf16.msra.mxu2 %v1392_v33 }
 0x209   : > { %1105 = vmatpush.bf16.msra.mxu3 %v1456_v34  ;;  %v1695_v34 = vld [vmem:[#allocation6 + $0x144] sm:$0xf] }
 0x20a   : > { %1788 = vset.pattern.permute.xlu2 %v552_v27  ;;  %v1712_v27 = vld [vmem:[#allocation6 + $0x1c4] sm:$0xf0] }
 0x20b   : > { %554 = vperm.xlu1 %1787, %v537_v26  }
 0x212   : > { %579 = vperm.xlu2 %1788, %v562_v25  }
 0x213   : > { %1789 = vset.pattern.permute.xlu1 %v558_v28 }
 0x21a   : > { %1790 = vset.pattern.permute.xlu2 %v558_v28 }
 0x21b   : > { %560 = vperm.xlu1 %1789, %v537_v26   ;;  %v1552_v26 = vor.u32 %v1696_v24, %v1551_v23  ;;  %v1669_v23 = vld [vmem:[#allocation6 + $0x74] sm:$0xf]  ;;  %v1449_v24 = vld [vmem:[#allocation6 + $0x78] sm:$0xf0] }
 0x21c   : > { %v1452_v35 = vor.u32 %v1669_v23, %v1449_v24  ;;  %v1625_v24 = vld [vmem:[#allocation6 + $0x1d8] sm:$0xf0] }
 0x21d   : > { %1114 = vmatpush.bf16.msrb.mxu1 %v1552_v26  ;;  %v1513_v26 = vld [vmem:[#allocation6 + $0xf8] sm:$0xf0] }
 0x21e   : > { %1137 = vmatpush.bf16.msrb.mxu2 %v1452_v35  ;;  %v1553_v35 = vld [vmem:[#allocation6 + $0x148] sm:$0xf0] }
 0x221   : > { %1115 = vmatpush.bf16.msrb.mxu1 %v1544_v39  ;;  %v1717_v39 = vld [vmem:[#allocation6 + $0x1f4] sm:$0xf] }
 0x222   : > { %585 = vperm.xlu2 %1790, %v562_v25   ;;  %v1615_v25 = vld [vmem:[#allocation6 + $0x1c0] sm:$0xf]  ;;  %v1644_v49 = vor.u32 %v1717_v39, %v1641_v43 }
 0x223   : > { %v1616_v29 = vor.u32 %v1712_v27, %v1615_v25  ;;  %v1685_v25 = vld [vmem:[#allocation6 + $0xf4] sm:$0xf]  ;;  %v1519_v27 = vld [vmem:[#allocation6 + $0x100] sm:$0xf] }
 0x224   : > { %v1516_v36 = vor.u32 %v1685_v25, %v1513_v26  ;;  %v1520_v40 = vor.u32 %v1688_v30, %v1519_v27  ;;  %v1663_v25 = vld [vmem:[#allocation6 + $0x44] sm:$0xf]  ;;  %v1425_v26 = vld [vmem:[#allocation6 + $0x48] sm:$0xf0]  ;;  %v1564_v27 = vor.u32 %v1697_v15, %v1561_v16 }
 0x225   : > { %1127 = vmatpush.bf16.msrb.mxu0 %v1616_v29  ;;  %1116 = vmatpush.bf16.msrb.mxu1 %v1536_v52  ;;  %v1444_v52 = vor.u32 %v1667_v44, %v1441_v46  ;;  %v1489_v30 = vld [vmem:[#allocation6 + $0xc8] sm:$0xf0]  ;;  %v1428_v33 = vor.u32 %v1663_v25, %v1425_v26  ;;  %v1556_v44 = vor.u32 %v1695_v34, %v1553_v35  ;;  %v1661_v46 = vld [vmem:[#allocation6 + $0x34] sm:$0xf]  ;;  %v1691_v16 = vld [vmem:[#allocation6 + $0x124] sm:$0xf] }
 0x226   : > { %1150 = vmatpush.bf16.msrb.mxu3 %v1516_v36  ;;  %v1473_v15 = vld [vmem:[#allocation6 + $0xa8] sm:$0xf0] }
 0x227   : > { %1138 = vmatpush.bf16.msrb.mxu2 %v1444_v52 }
 0x229   : > { %1128 = vmatpush.bf16.msrb.mxu0 %v1608_v41  ;;  %1117 = vmatpush.bf16.msrb.mxu1 %v1528_v45  ;;  %v1584_v41 = vor.u32 %v1704_v32, %v1583_v31  ;;  %v1497_v45 = vld [vmem:[#allocation6 + $0xd8] sm:$0xf0]  ;;  %v1628_v32 = vor.u32 %v1713_v17, %v1625_v24  ;;  %v1537_v17 = vld [vmem:[#allocation6 + $0x128] sm:$0xf0] }
 0x22a   : > { %1151 = vmatpush.bf16.msrb.mxu3 %v1508_v53  ;;  %v1540_v35 = vor.u32 %v1691_v16, %v1537_v17 }
 0x22d   : > { %1129 = vmatpush.bf16.msrb.mxu0 %v1600_v56  ;;  %v1715_v56 = vld [vmem:[#allocation6 + $0x1e4] sm:$0xf]  ;;  %1118 = vmatpush.bf16.msrb.mxu1 %v1520_v40 }
 0x22e   : > { %v1711_v40 = vld [vmem:[#allocation6 + $0x1c4] sm:$0xf] }
 0x231   : > { %1130 = vmatpush.bf16.msrb.mxu0 %v1592_v8  ;;  %1163 = vmatpush.bf16.msra.mxu1 %v1580_v42  ;;  %v1436_v8 = vor.u32 %v1665_v62, %v1433_v63 }
 0x233   : > { %1139 = vmatpush.bf16.msrb.mxu2 %v1436_v8 }
 0x235   : > { %1131 = vmatpush.bf16.msrb.mxu0 %v1584_v41  ;;  %1164 = vmatpush.bf16.msra.mxu1 %v1572_v59  ;;  %v1617_v41 = vld [vmem:[#allocation6 + $0x1c8] sm:$0xf0]  ;;  %v1709_v59 = vld [vmem:[#allocation6 + $0x1b4] sm:$0xf] }
 0x237   : > { %1140 = vmatpush.bf16.msrb.mxu2 %v1428_v33 }
 0x239   : > { %1176 = vmatpush.bf16.msra.mxu0 %v1644_v49  ;;  %1165 = vmatpush.bf16.msra.mxu1 %v1564_v27  ;;  %v1677_v49 = vld [vmem:[#allocation6 + $0xb4] sm:$0xf] }
 0x23d   : > { %1166 = vmatpush.bf16.msra.mxu1 %v1556_v44 }
 0x254   : > { %v2215_v28 = vpop.permute.xlu2 %548 }
 0x25c   : > { %v2217_v61 = vpop.permute.xlu2 %573 }
 0x25d   : > { %v2224_v57 = vmul.f32 %v2217_v61, %v2124_v9  ;;  %v2233_v9 = vmul.f32 %v2217_v61, %v2127_v10 }
 0x26c   : > { %v568_v29 = vpop.permute.xlu0 %567  ;;  %v580_v48 = vpop.permute.xlu2 %579 }
 0x26d   : > { %v2220_v47 = vmul.f32 %v568_v29, %v2100_v0  ;;  %v1633_v0 = vld [vmem:[#allocation6 + $0x1e8] sm:$0xf0]  ;;  %v2227_v58 = vmul.f32 %v568_v29, %v2103_v1  ;;  %v1500_v1 = vor.u32 %v1681_v3, %v1497_v45  ;;  %v2236_v22 = vmul.f32 %v580_v48, %v2136_v13  ;;  %v1679_v29 = vld [vmem:[#allocation6 + $0xc4] sm:$0xf]  ;;  %v543_v36 = vpop.permute.xlu1 %542 }
 0x26e   : > { %v1636_v60 = vor.u32 %v1715_v56, %v1633_v0  ;;  %v2239_v23 = vmul.f32 %v580_v48, %v2139_v14  ;;  %v1492_v39 = vor.u32 %v1679_v29, %v1489_v30  ;;  %v1417_v48 = vld [vmem:[#allocation6 + $0x38] sm:$0xf0]  ;;  %v1484_v56 = vor.u32 %v1677_v49, %v1481_v50  ;;  %v1659_v3 = vld [vmem:[#allocation6 + $0x24] sm:$0xf]  ;;  %v1457_v50 = vld [vmem:[#allocation6 + $0x88] sm:$0xf0] }
 0x26f   : > { %v657_v7 = vadd.f32 %v2224_v57, %v2220_v47  ;;  %v621_v10 = vmax.f32 %v2220_v47, %v2224_v57  ;;  %v666_v61 = vadd.f32 %v2233_v9, %v2227_v58  ;;  %v630_v13 = vmax.f32 %v2227_v58, %v2233_v9  ;;  %1152 = vmatpush.bf16.msrb.mxu3 %v1500_v1  ;;  %v1545_v0 = vld [vmem:[#allocation6 + $0x138] sm:$0xf0]  ;;  %v1675_v45 = vld [vmem:[#allocation6 + $0xa4] sm:$0xf] }
 0x270   : > { %1177 = vmatpush.bf16.msra.mxu0 %v1636_v60  ;;  %v1420_v55 = vor.u32 %v1661_v46, %v1417_v48  ;;  %v1609_v60 = vld [vmem:[#allocation6 + $0x1b8] sm:$0xf0]  ;;  %v1548_v8 = vor.u32 %v1693_v54, %v1545_v0  ;;  %v2266_v27 = vmul.f32 %v543_v36, %v2106_v2  ;;  %v2269_v29 = vmul.f32 %v543_v36, %v2111_v4  ;;  %v1705_v46 = vld [vmem:[#allocation6 + $0x194] sm:$0xf]  ;;  %v1655_v49 = vld [vmem:[#allocation6 + $0x4] sm:$0xf] }
 0x271   : > { %v658_v14 = vadd.f32 %v657_v7, %v2236_v22  ;;  %v667_v42 = vadd.f32 %v666_v61, %v2239_v23  ;;  %v631_v51 = vmax.f32 %v630_v13, %v2239_v23  ;;  %v1409_v7 = vld [vmem:[#allocation6 + $0x28] sm:$0xf0]  ;;  %v1612_v1 = vor.u32 %v1709_v59, %v1609_v60  ;;  %v1593_v48 = vld [vmem:[#allocation6 + $0x198] sm:$0xf0]  ;;  %v1687_v54 = vld [vmem:[#allocation6 + $0x104] sm:$0xf] }
 0x272   : > { %1141 = vmatpush.bf16.msrb.mxu2 %v1420_v55  ;;  %v1412_v26 = vor.u32 %v1659_v3, %v1409_v7  ;;  %v2263_v61 = vmul.f32 %v2215_v28, %v2130_v11  ;;  %v1476_v30 = vor.u32 %v1675_v45, %v1473_v15  ;;  %v1601_v13 = vld [vmem:[#allocation6 + $0x1a8] sm:$0xf0]  ;;  %1167 = vmatpush.bf16.msra.mxu1 %v1548_v8  ;;  %v1673_v11 = vld [vmem:[#allocation6 + $0x94] sm:$0xf]  ;;  %v1703_v3 = vld [vmem:[#allocation6 + $0x184] sm:$0xf] }
 0x273   : > { %1153 = vmatpush.bf16.msrb.mxu3 %v1492_v39  ;;  %v1465_v39 = vld [vmem:[#allocation6 + $0x98] sm:$0xf0]  ;;  %v1596_v59 = vor.u32 %v1705_v46, %v1593_v48  ;;  %v1521_v60 = vld [vmem:[#allocation6 + $0x108] sm:$0xf0] }
 0x274   : > { %1178 = vmatpush.bf16.msra.mxu0 %v1628_v32  ;;  %v2273_v32 = vmul.f32 %v2215_v28, %v2133_v12  ;;  %v1468_v28 = vor.u32 %v1673_v11, %v1465_v39  ;;  %v1585_v7 = vld [vmem:[#allocation6 + $0x188] sm:$0xf0] }
 0x276   : > { %1142 = vmatpush.bf16.msrb.mxu2 %v1412_v26  ;;  %1168 = vmatpush.bf16.msra.mxu1 %v1540_v35  ;;  %v648_v55 = vadd.f32 %v2273_v32, %v2269_v29 }
 0x277   : > { %1154 = vmatpush.bf16.msrb.mxu3 %v1484_v56 }
 0x27b   : > { %1155 = vmatpush.bf16.msrb.mxu3 %v1476_v30  ;;  %v1588_v30 = vor.u32 %v1703_v3, %v1585_v7 }
 0x27c   : > { %v586_v31 = vpop.permute.xlu2 %585 }
 0x27d   : > { %v2249_v37 = vmul.f32 %v586_v31, %v2148_v18  ;;  %v2252_v38 = vmul.f32 %v586_v31, %v2151_v19  ;;  %v1620_v18 = vor.u32 %v1711_v40, %v1617_v41  ;;  %v622_v19 = vmax.f32 %v621_v10, %v2236_v22  ;;  %v555_v25 = vpop.permute.xlu1 %554  ;;  %v1707_v10 = vld [vmem:[#allocation6 + $0x1a4] sm:$0xf]  ;;  %v1401_v31 = vld [vmem:[#allocation6 + $0x18] sm:$0xf0]  ;;  %v1689_v41 = vld [vmem:[#allocation6 + $0x114] sm:$0xf] }
 0x27e   : > { %v2276_v2 = vmul.f32 %v555_v25, %v2114_v5  ;;  %v2279_v4 = vmul.f32 %v555_v25, %v2117_v6  ;;  %v1604_v36 = vor.u32 %v1707_v10, %v1601_v13  ;;  %v612_v5 = vmax.f32 %v2269_v29, %v2273_v32  ;;  %v1393_v6 = vld [vmem:[#allocation6 + $0x8] sm:$0xf0] }
 0x27f   : > { %v659_v43 = vadd.f32 %v658_v14, %v2249_v37  ;;  %v668_v53 = vadd.f32 %v667_v42, %v2252_v38  ;;  %v623_v62 = vmax.f32 %v622_v19, %v2249_v37  ;;  %v632_v63 = vmax.f32 %v631_v51, %v2252_v38  ;;  %1179 = vmatpush.bf16.msra.mxu0 %v1620_v18  ;;  %v1657_v14 = vld [vmem:[#allocation6 + $0x14] sm:$0xf]  ;;  %v1529_v42 = vld [vmem:[#allocation6 + $0x118] sm:$0xf0]  ;;  %v1671_v18 = vld [vmem:[#allocation6 + $0x84] sm:$0xf] }
 0x280   : > { %v1404_v12 = vor.u32 %v1657_v14, %v1401_v31  ;;  %v639_v19 = vadd.f32 %v2263_v61, %v2266_v27  ;;  %v613_v0 = vmax.f32 %v612_v5, %v2279_v4  ;;  %1156 = vmatpush.bf16.msrb.mxu3 %v1468_v28  ;;  %v649_v16 = vadd.f32 %v648_v55, %v2279_v4 }
 0x281   : > { %v660_v52 = vrot.slane %v659_v43, 4  ;;  %v669_v24 = vrot.slane %v668_v53, 4  ;;  %v624_v33 = vrot.slane %v623_v62, 4  ;;  %v633_v34 = vrot.slane %v632_v63, 4 }
 0x282   : > { %1143 = vmatpush.bf16.msrb.mxu2 %v1404_v12  ;;  %v640_v15 = vadd.f32 %v639_v19, %v2276_v2  ;;  %v1524_v10 = vor.u32 %v1687_v54, %v1521_v60 }
 0x283   : > { %v661_v40 = vadd.f32 %v660_v52, %v659_v43  ;;  %1180 = vmatpush.bf16.msra.mxu0 %v1612_v1  ;;  %v670_v44 = vadd.f32 %v669_v24, %v668_v53  ;;  %v603_v43 = vmax.f32 %v2266_v27, %v2263_v61  ;;  %v625_v51 = vmax.f32 %v623_v62, %v624_v33 }
 0x284   : > { %v634_v52 = vmax.f32 %v632_v63, %v633_v34  ;;  %v1532_v53 = vor.u32 %v1689_v41, %v1529_v42  ;;  %v1396_v62 = vor.u32 %v1655_v49, %v1393_v6  ;;  %v1460_v63 = vor.u32 %v1671_v18, %v1457_v50 }
 0x285   : > { %v604_v56 = vmax.f32 %v603_v43, %v2276_v2  ;;  %v662_v45 = vrot.slane %v661_v40, 2  ;;  %v671_v8 = vrot.slane %v670_v44, 2  ;;  %v626_v25 = vrot.slane %v625_v51, 2 }
 0x286   : > { %v635_v26 = vrot.slane %v634_v52, 2  ;;  %1169 = vmatpush.bf16.msra.mxu1 %v1532_v53  ;;  %1144 = vmatpush.bf16.msrb.mxu2 %v1396_v62 }
 0x287   : > { %1181 = vmatpush.bf16.msra.mxu0 %v1604_v36  ;;  %v663_v34 = vadd.f32 %v662_v45, %v661_v40  ;;  %1157 = vmatpush.bf16.msrb.mxu3 %v1460_v63  ;;  %v627_v36 = vmax.f32 %v625_v51, %v626_v25 }
 0x288   : > { %v636_v41 = vmax.f32 %v634_v52, %v635_v26 }
 0x289   : > { %v664_v48 = vrot.slane %v663_v34, 1  ;;  %v628_v6 = vrot.slane %v627_v36, 1 }
 0x28a   : > { %1170 = vmatpush.bf16.msra.mxu1 %v1524_v10  ;;  %v637_v18 = vrot.slane %v636_v41, 1 }
 0x28b   : > { %1182 = vmatpush.bf16.msra.mxu0 %v1596_v59  ;;  %v665_v51 = vadd.f32 %v664_v48, %v663_v34  ;;  %v629_v60 = vmax.f32 %v627_v36, %v628_v6 }
 0x28c   : > { %v638_v3 = vmax.f32 %v636_v41, %v637_v18 }
 0x28d   : > { %v561_v1 = vpop.permute.xlu1 %560  ;;  %v677_v62 = vmul.f32 0.03125, %v665_v51 }
 0x28e   : > { %v2294_v17 = vmul.f32 %v561_v1, %v2154_v20  ;;  %v2297_v24 = vmul.f32 %v561_v1, %v2157_v21  ;;  %v672_v20 = vadd.f32 %v671_v8, %v670_v44 }
 0x28f   : > { %1183 = vmatpush.bf16.msra.mxu0 %v1588_v30 }
 0x290   : > { %v605_v13 = vmax.f32 %v604_v56, %v2294_v17  ;;  %v614_v14 = vmax.f32 %v613_v0, %v2297_v24  ;;  %v641_v31 = vadd.f32 %v640_v15, %v2294_v17  ;;  %v650_v33 = vadd.f32 %v649_v16, %v2297_v24 }
 0x291   : > { %v673_v49 = vrot.slane %v672_v20, 1 }
 0x292   : > { %v606_v21 = vrot.slane %v605_v13, 4  ;;  %v615_v35 = vrot.slane %v614_v14, 4  ;;  %v642_v11 = vrot.slane %v641_v31, 4  ;;  %v651_v39 = vrot.slane %v650_v33, 4 }
 0x293   : > { %v674_v52 = vadd.f32 %v673_v49, %v672_v20 }
 0x294   : > { %v607_v42 = vmax.f32 %v605_v13, %v606_v21  ;;  %v616_v12 = vmax.f32 %v614_v14, %v615_v35  ;;  %v643_v28 = vadd.f32 %v642_v11, %v641_v31  ;;  %v652_v46 = vadd.f32 %v651_v39, %v650_v33 }
 0x295   : > { %v678_v63 = vmul.f32 0.03125, %v674_v52  ;;  %v764_v21 = vstv %s763_s13 }
 0x296   : > { %v608_v43 = vrot.slane %v607_v42, 2  ;;  %v617_v5 = vrot.slane %v616_v12, 2  ;;  %v644_v40 = vrot.slane %v643_v28, 2  ;;  %v653_v44 = vrot.slane %v652_v46, 2 }
 0x298   : > { %v645_v50 = vadd.f32 %v644_v40, %v643_v28  ;;  %v654_v19 = vadd.f32 %v653_v44, %v652_v46  ;;  %v609_v53 = vmax.f32 %v607_v42, %v608_v43  ;;  %v618_v54 = vmax.f32 %v616_v12, %v617_v5 }
 0x29a   : > { %v646_v55 = vrot.slane %v645_v50, 1  ;;  %v655_v56 = vrot.slane %v654_v19, 1  ;;  %v610_v0 = vrot.slane %v609_v53, 1  ;;  %v619_v59 = vrot.slane %v618_v54, 1 }
 0x29c   : > { %v611_v7 = vmax.f32 %v609_v53, %v610_v0  ;;  %v620_v45 = vmax.f32 %v618_v54, %v619_v59  ;;  %v647_v8 = vadd.f32 %v646_v55, %v645_v50  ;;  %v656_v1 = vadd.f32 %v655_v56, %v654_v19 }
 0x29e   : > { %v683_v15 = vsel %vm422_vm3, %v629_v60, %v611_v7  ;;  %v684_v16 = vsel %vm422_vm3, %v638_v3, %v620_v45  ;;  %v675_v25 = vmul.f32 0.03125, %v647_v8  ;;  %v676_v26 = vmul.f32 0.03125, %v656_v1 }
 0x29f   : > { %v695_v10 = vpack.c.bf16 %v683_v15, %v683_v15  ;;  %v696_v30 = vpack.c.bf16 %v684_v16, %v684_v16 }
 0x2a0   : > { %v691_v13 = vsel %vm422_vm3, %v677_v62, %v675_v25  ;;  %v692_v14 = vsel %vm422_vm3, %v678_v63, %v676_v26 }
 0x2a1   : > { %1093 = vmatmul.bf16.vlgmr.msra.gmra.mxu2 %v695_v10  ;;  %1106 = vmatmul.bf16.vlgmr.msra.gmra.mxu3 %v696_v30  ;;  %v697_v31 = vpack.c.bf16 %v691_v13, %v691_v13  ;;  %v698_v33 = vpack.c.bf16 %v692_v14, %v692_v14 }
 0x2a3   : > { %1119 = vmatmul.bf16.vlgmr.msrb.gmra.mxu1 %v697_v31  ;;  %1132 = vmatmul.bf16.vlgmr.msrb.gmra.mxu0 %v698_v33 }
 0x2b1   : > { %1145 = vmatmul.bf16.vlgmr.msrb.gmra.mxu2 %v695_v10  ;;  %1158 = vmatmul.bf16.vlgmr.msrb.gmra.mxu3 %v696_v30 }
 0x2b3   : > { %1171 = vmatmul.bf16.vlgmr.msra.gmra.mxu1 %v697_v31  ;;  %1184 = vmatmul.bf16.vlgmr.msra.gmra.mxu0 %v698_v33 }
 0x320   : > { %v1120_v34 = vpop.f32.mrf.mxu1  ;;  %v1133_v20 = vpop.f32.mrf.mxu0 }
 0x324   : > { %v1094_v35 = vpop.f32.mrf.mxu2  ;;  %v1107_v11 = vpop.f32.mrf.mxu3 }
 0x325   : > { %v1095_v39 = vadd.f32 %v1094_v35, %v764_v21 }
 0x327   : > { %v1108_v36 = vadd.f32 %v1107_v11, %v1095_v39 }
 0x328   : > { %v1122_v41 = vpop.f32.mrf.mxu1  ;;  %v1135_v42 = vpop.f32.mrf.mxu0 }
 0x329   : > { %v1121_v12 = vadd.f32 %v1120_v34, %v1108_v36 }
 0x32b   : > { %v1134_v28 = vadd.f32 %v1133_v20, %v1121_v12 }
 0x32c   : > { %v1096_v46 = vpop.f32.mrf.mxu2  ;;  %v1109_v48 = vpop.f32.mrf.mxu3 }
 0x32d   : > { %v1645_v49 = vmul.f32 -1.442695, %v1134_v28 }
 0x32f   : > { %1798 = vpow2.f32 %v1645_v49 }
 0x330   : > { %v1172_v43 = vpop.f32.mrf.mxu1  ;;  %v1185_v5 = vpop.f32.mrf.mxu0 }
 0x334   : > { %v1146_v40 = vpop.f32.mrf.mxu2  ;;  %v1159_v44 = vpop.f32.mrf.mxu3 }
 0x335   : > { %v1147_v6 = vadd.f32 %v1146_v40, %v764_v21  ;;  %v1799_v18 = vpop.eup %1798 }
 0x336   : > { %v1195_v51 = vadd.f32 1.0, %v1799_v18 }
 0x337   : > { %v1160_v50 = vadd.f32 %v1159_v44, %v1147_v6 }
 0x338   : > { %v1174_v19 = vpop.f32.mrf.mxu1  ;;  %v1187_v53 = vpop.f32.mrf.mxu0  ;;  %1800 = vrcp.f32 %v1195_v51  ;;  %vm1202_vm14 = vweird.f32 %v1195_v51  ;;  %v1208_v10 = vand.u32 2147483648, %v1195_v51  ;;  %v1206_v30 = vand.u32 2147483647, %v1195_v51 }
 0x339   : > { %v1173_v54 = vadd.f32 %v1172_v43, %v1160_v50 }
 0x33a   : > { %v1209_v34 = vor.u32 1.1754944e-38, %v1208_v10  ;;  %vm1207_vm5 = vcmp.eq.f32.partialorder %v1206_v30, 8.507059e+37 }
 0x33b   : > { %v1186_v52 = vadd.f32 %v1185_v5, %v1173_v54 }
 0x33c   : > { %v1148_v55 = vpop.f32.mrf.mxu2  ;;  %v1161_v56 = vpop.f32.mrf.mxu3 }
 0x33d   : > { %v1646_v0 = vmul.f32 -1.442695, %v1186_v52 }
 0x33e   : > { %v1801_v59 = vpop.eup %1800 }
 0x33f   : > { %1802 = vpow2.f32 %v1646_v0  ;;  %v1198_v7 = vmul.f32 %v1801_v59, %v1195_v51  ;;  %vm1203_vm12 = vweird.f32 %v1801_v59 }
 0x340   : > { %vm1204_vm15 = vmor %vm1202_vm14, %vm1203_vm12 }
 0x341   : > { %v1199_v45 = vsub.f32 1.0, %v1198_v7 }
 0x343   : > { %v1200_v1 = vmul.f32 %v1801_v59, %v1199_v45 }
 0x345   : > { %v1803_v60 = vpop.eup %1802  ;;  %v1201_v16 = vadd.f32 %v1801_v59, %v1200_v1 }
 0x346   : > { %v1196_v3 = vadd.f32 1.0, %v1803_v60 }
 0x347   : > { %v1205_v31 = vsel %vm1204_vm15, %v1801_v59, %v1201_v16 }
 0x348   : > { %1804 = vrcp.f32 %v1196_v3  ;;  %v1223_v15 = vand.u32 2147483648, %v1196_v3  ;;  %v1221_v26 = vand.u32 2147483647, %v1196_v3  ;;  %vm1217_vm0 = vweird.f32 %v1196_v3 }
 0x349   : > { %v1210_v35 = vsel %vm1207_vm5, %v1209_v34, %v1205_v31 }
 0x34a   : > { %v1224_v14 = vor.u32 1.1754944e-38, %v1223_v15  ;;  %vm1222_vm2 = vcmp.eq.f32.partialorder %v1221_v26, 8.507059e+37 }
 0x34e   : > { %v1805_v8 = vpop.eup %1804 }
 0x34f   : > { %v1213_v62 = vmul.f32 %v1805_v8, %v1196_v3  ;;  %vm1218_vm13 = vweird.f32 %v1805_v8 }
 0x350   : > { %vm1219_vm1 = vmor %vm1217_vm0, %vm1218_vm13 }
 0x351   : > { %v1214_v63 = vsub.f32 1.0, %v1213_v62 }
 0x353   : > { %v1215_v25 = vmul.f32 %v1805_v8, %v1214_v63 }
 0x355   : > { %v1216_v13 = vadd.f32 %v1805_v8, %v1215_v25 }
 0x357   : > { %v1220_v33 = vsel %vm1219_vm1, %v1805_v8, %v1216_v13 }
 0x358   : > { %v1225_v20 = vsel %vm1222_vm2, %v1224_v14, %v1220_v33 }
 0x359   : > { %v1229_v21 = vrot.slane %v1225_v20, 7 }
 0x35b   : > { %v1231_v11 = vsel %vm1230_vm4, %v1210_v35, %v1229_v21  ;;  %v1232_v39 = vsel %vm422_vm3, %v1210_v35, %v1229_v21 }
 0x35c   : > { %v1233_v36 = vrot.slane %v1232_v39, 1  ;;  %v1234_v41 = vperm.slane %v1231_v11, 0  ;;  %v1235_v42 = vperm.slane %v1231_v11, 1 }
 0x35e   : > { %v1242_v12 = vmul.f32 %v1234_v41, %v2266_v27  ;;  %v1243_v28 = vmul.f32 %v1235_v42, %v2269_v29  ;;  %v1244_v46 = vmul.f32 %v1234_v41, %v2263_v61  ;;  %v1245_v48 = vmul.f32 %v1235_v42, %v2273_v32 }
 0x35f   : > { %v1236_v49 = vperm.slane %v1233_v36, 0  ;;  %v1246_v43 = vmul.f32 %v1234_v41, %v2276_v2  ;;  %v1237_v27 = vperm.slane %v1233_v36, 1  ;;  %v1247_v61 = vmul.f32 %v1235_v42, %v2279_v4 }
 0x360   : > { %1258 = vst [vmem:[%s2315_s12] sm:$0xff] %v1242_v12  ;;  %v1248_v29 = vmul.f32 %v1234_v41, %v2294_v17  ;;  %v1249_v32 = vmul.f32 %v1235_v42, %v2297_v24 }
 0x361   : > { %1259 = vst [vmem:[%s2315_s12 + $0x8] sm:$0xff] %v1243_v28  ;;  %v1250_v2 = vmul.f32 %v1236_v49, %v2220_v47  ;;  %v1251_v5 = vmul.f32 %v1237_v27, %v2227_v58  ;;  %v1252_v4 = vmul.f32 %v1236_v49, %v2224_v57  ;;  %v1253_v17 = vmul.f32 %v1237_v27, %v2233_v9 }
 0x362   : > { %1260 = vst [vmem:[%s2315_s12 + $0x10] sm:$0xff] %v1244_v46  ;;  %v1254_v47 = vmul.f32 %v1236_v49, %v2236_v22  ;;  %v1255_v58 = vmul.f32 %v1237_v27, %v2239_v23  ;;  %v1256_v57 = vmul.f32 %v1236_v49, %v2249_v37  ;;  %v1257_v24 = vmul.f32 %v1237_v27, %v2252_v38 }
 0x363   : > { %1261 = vst [vmem:[%s2315_s12 + $0x18] sm:$0xff] %v1245_v48 }
 0x364   : > { %1262 = vst [vmem:[%s2315_s12 + $0x20] sm:$0xff] %v1246_v43 }
 0x365   : > { %1263 = vst [vmem:[%s2315_s12 + $0x28] sm:$0xff] %v1247_v61 }
 0x366   : > { %1264 = vst [vmem:[%s2315_s12 + $0x30] sm:$0xff] %v1248_v29 }
 0x367   : > { %1265 = vst [vmem:[%s2315_s12 + $0x38] sm:$0xff] %v1249_v32 }
 0x368   : > { %1266 = vst [vmem:[%s2315_s12 + $0x40] sm:$0xff] %v1250_v2 }
 0x369   : > { %1267 = vst [vmem:[%s2315_s12 + $0x48] sm:$0xff] %v1251_v5 }
 0x36a   : > { %1268 = vst [vmem:[%s2315_s12 + $0x50] sm:$0xff] %v1252_v4 }
 0x36b   : > { %1269 = vst [vmem:[%s2315_s12 + $0x58] sm:$0xff] %v1253_v17 }
 0x36c   : > { %1270 = vst [vmem:[%s2315_s12 + $0x60] sm:$0xff] %v1254_v47 }
 0x36d   : > { %1271 = vst [vmem:[%s2315_s12 + $0x68] sm:$0xff] %v1255_v58 }
 0x36e   : > { %1272 = vst [vmem:[%s2315_s12 + $0x70] sm:$0xff] %v1256_v57 }
 0x36f   : > { %1273 = vst [vmem:[%s2315_s12 + $0x78] sm:$0xff] %v1257_v24 }
 0x370   : > { %1893 = shalt.err (!%p1890_p10)
}
 0x371   : > { %s1943_s24 = smov 256   ;;  %s1944_s12 = smov 16  }
 0x372   : > { %1727 = dma.vmem_to_hbm [thread:$0]  (%p2055_p7), %s1289_s6, 2048, %s1291_s30, %s1275_s10, %s1943_s24, %s1943_s24, %s1944_s12  }
 0x373 PF: > { %s1305_s19 = sand.u32 1, %s1924_s26   ;;  %p2391_p12 = scmp.ge.s32.totalorder %s1936_s29, 2 }
 0x374   : > { %s1306_s15 = scalar_lea.sflag [#allocation5], %s1305_s19 }
 0x375   : > { %p1738_p13 = pnand %p2391_p12, %p2023_p6 }
 0x377   : > { %p1739_p0 = pneg %p1738_p13 }
 0x379   : > { %1919 = dma.done.wait (%p1739_p0), %s1306_s15, 2048  }
 0x37a   : > { %1921 = vsyncadd (%p1739_p0), %s1306_s15, 4294965248  ;;  %p22_p3 = scmp.ge.s32.totalorder %s2041_s16, 4   ;;  %s2392_s26 = smov %s1928_s27 }
 0x37b   : > { %s2393_s27 = smov %s1932_s28  ;;  %s2394_s28 = smov %s2051_s21 }
 0x37c   : > { %s2395_s29 = smov %s2041_s16  ;;  %24 = sbr.rel (!%p22_p3) target bundleno = 8 (0x8), region = 97 }
 0x381   :  { %1312 = vsyncpa [#allocation4], 1 }
 0x382   :  { %1314 = vsyncpa [#allocation4 + $0x1], 1 }
 0x383   :  { %1315 = vsyncpa [#allocation7], 1 }
 0x384   :  { %1316 = vsyncpa [#allocation5], 1 }
 0x385   :  { %1318 = vsyncpa [#allocation5 + $0x1], 1 }

</bundles_post_ra>
